<compile_context>
chip_gen: v7x
topology: tpu7x:2x2x1
jax: 0.10.0
libtpu: 0.0.40
codegen_flags: <defaults>
</compile_context>

<pallas_src>
import functools

import jax
import jax.numpy as jnp
import numpy as np
from jax.experimental import pallas as pl
from jax.experimental.pallas import tpu as pltpu


# --------------------------------------------------------------------------
# Kernel
# --------------------------------------------------------------------------
def lora_attn_kernel(q_ref, k_ref, v_ref,
                     wqt_ref, bq_ref, wkt_ref, bk_ref,
                     wvt_ref, bv_ref, wot_ref, bo_ref,
                     out_ref, *, batch_block, seq_len):
    TB, S = batch_block, seq_len
    Ep = q_ref.shape[-1]

    def proj(x_ref, wt_ref, b_ref):
        # bf16 MXU inputs, f32 accumulation; bias is added post-MXU in f32.
        x = x_ref[...].astype(jnp.bfloat16)
        return jnp.dot(x, wt_ref[...], preferred_element_type=jnp.float32) + b_ref[...]

    # Effective weights already contain the LoRA delta; W_Q^T / b_Q already
    # carry the 1/sqrt(E) attention scale.  Shapes: (TB*S, Ep) -> (TB, S, Ep).
    Q = proj(q_ref, wqt_ref, bq_ref).reshape(TB, S, Ep)
    K = proj(k_ref, wkt_ref, bk_ref).reshape(TB, S, Ep)
    V = proj(v_ref, wvt_ref, bv_ref).reshape(TB, S, Ep)

    # Batched attention over the TB batch elements in this grid step.
    scores = jnp.einsum("bqe,bke->bqk",
                        Q.astype(jnp.bfloat16), K.astype(jnp.bfloat16),
                        preferred_element_type=jnp.float32)

    # Numerically stable softmax, all f32 (VPU); reciprocal goes to the EUP.
    m = jnp.max(scores, axis=-1, keepdims=True)
    e = jnp.exp(scores - m)
    denom = jnp.sum(e, axis=-1, keepdims=True)
    attn = e * pl.reciprocal(denom, approx=True)

    ctx = jnp.einsum("bqk,bke->bqe",
                     attn.astype(jnp.bfloat16), V.astype(jnp.bfloat16),
                     preferred_element_type=jnp.float32)
    ctx = ctx.reshape(TB * S, Ep).astype(jnp.bfloat16)

    out = jnp.dot(ctx, wot_ref[...], preferred_element_type=jnp.float32) + bo_ref[...]
    out_ref[...] = out.astype(out_ref.dtype)


# --------------------------------------------------------------------------
# One-time parameter packing (amortized over forward calls)
# --------------------------------------------------------------------------
def pack_params(params, lane_multiple=128):
    """Pre-transpose frozen weights, fold LoRA deltas and the 1/sqrt(E) scale,
    zero-pad to a lane-dense Ep, and store MXU weights in bf16."""
    E = params["W_Q"].shape[0]
    Ep = pl.cdiv(E, lane_multiple) * lane_multiple
    scale = 1.0 / (E ** 0.5)

    def eff_t(W, A, Bm):
        # x @ W.T + (x @ A.T) @ B.T  ==  x @ (W.T + A.T @ B.T)   (exact fold)
        return W.T + A.T @ Bm.T

    def pad_w(wt):  # (E, E) -> (Ep, Ep) bf16, zero padded
        return jnp.zeros((Ep, Ep), jnp.float32).at[:E, :E].set(wt).astype(jnp.bfloat16)

    def pad_b(b):   # (1, E) -> (1, Ep) f32 (bias is added post-MXU in f32)
        return jnp.zeros((1, Ep), jnp.float32).at[:, :E].set(b)

    return {
        "E": E, "Ep": Ep,
        "WqT": pad_w(eff_t(params["W_Q"], params["A_Q"], params["B_Q"]) * scale),
        "bQ":  pad_b(params["b_Q"] * scale),
        "WkT": pad_w(eff_t(params["W_K"], params["A_K"], params["B_K"])),
        "bK":  pad_b(params["b_K"]),
        "WvT": pad_w(eff_t(params["W_V"], params["A_V"], params["B_V"])),
        "bV":  pad_b(params["b_V"]),
        "WoT": pad_w(params["W_O"].T),
        "bO":  pad_b(params["b_O"]),
    }


# --------------------------------------------------------------------------
# Wrapper
# --------------------------------------------------------------------------
_VMEM_LIMIT_BYTES = 48 * 1024 * 1024   # fits v7x 64 MiB/TC; plenty on v5e/v6e


def _pick_batch_block(B, S, max_rows=512, min_grid_steps=2):
    """Largest batch block with TB*S <= max_rows rows per step, preferring
    >= min_grid_steps grid steps so ("parallel",) shards across v7x's 2 TCs."""
    ok = [tb for tb in range(1, B + 1)
          if B % tb == 0 and tb * S <= max_rows
          and (tb == B or (tb * S) % 8 == 0)]        # (8,128) rule on the row block
    if not ok:
        return B                                     # full-array block is always legal
    multi = [tb for tb in ok if B // tb >= min_grid_steps]
    return max(multi) if multi else max(ok)


def _lora_attention_call(qf, kf, vf, packed, *, B, S, TB, Ep, single_buffer_weights):
    R = TB * S
    seq_spec = pl.BlockSpec((R, Ep), lambda b: (b, 0))

    def weight_spec(shape):
        if single_buffer_weights:
            # Grid-invariant operand: one resident VMEM copy instead of two.
            return pl.BlockSpec(shape, lambda b: (0, 0), pipeline_mode=pl.Buffered(1))
        return pl.BlockSpec(shape, lambda b: (0, 0))

    in_specs = [seq_spec, seq_spec, seq_spec]
    for _ in range(4):                               # Q, K, V, O projections
        in_specs += [weight_spec((Ep, Ep)), weight_spec((1, Ep))]

    call = pl.pallas_call(
        functools.partial(lora_attn_kernel, batch_block=TB, seq_len=S),
        out_shape=jax.ShapeDtypeStruct((B * S, Ep), jnp.float32),
        grid_spec=pltpu.PrefetchScalarGridSpec(
            num_scalar_prefetch=0,
            grid=(B // TB,),
            in_specs=in_specs,
            out_specs=seq_spec,
        ),
        compiler_params=pltpu.CompilerParams(
            dimension_semantics=("parallel",),
            vmem_limit_bytes=_VMEM_LIMIT_BYTES,
        ),
    )
    return call(qf, kf, vf,
                packed["WqT"], packed["bQ"], packed["WkT"], packed["bK"],
                packed["WvT"], packed["bV"], packed["WoT"], packed["bO"])


def lora_attention(query, key, value, packed):
    B, S, E = query.shape
    Ep = packed["Ep"]
    TB = _pick_batch_block(B, S)

    def prep(x):
        # Lane-dense padding + pre-flattening in the wrapper (one-time layout
        # plumbing), so the kernel block is (TB*S, Ep) with no per-step relayout.
        if Ep != E:
            x = jnp.pad(x, ((0, 0), (0, 0), (0, Ep - E)))
        return x.reshape(B * S, Ep)

    qf, kf, vf = prep(query), prep(key), prep(value)

    try:
        out = jax.block_until_ready(
            _lora_attention_call(qf, kf, vf, packed, B=B, S=S, TB=TB, Ep=Ep,
                                 single_buffer_weights=True))
    except Exception:
        # Older jax without BlockSpec.pipeline_mode: fall back to default
        # double buffering (semantically identical, just more weight VMEM).
        out = jax.block_until_ready(
            _lora_attention_call(qf, kf, vf, packed, B=B, S=S, TB=TB, Ep=Ep,
                                 single_buffer_weights=False))

    return out[:, :E].reshape(B, S, E)


# --------------------------------------------------------------------------
# Pure-JAX reference mirroring the PyTorch forward (unfolded params, f32)
# --------------------------------------------------------------------------
def lora_attention_ref(query, key, value, params):
    E = query.shape[-1]

    with jax.default_matmul_precision("float32"):
        def lin(x, w, b):
            return jnp.einsum("bse,fe->bsf", x, w) + b

        def lora(x, A, Bm):
            return jnp.einsum("bsr,er->bse", jnp.einsum("bse,re->bsr", x, A), Bm)

        Q = lin(query, params["W_Q"], params["b_Q"]) + lora(query, params["A_Q"], params["B_Q"])
        K = lin(key,   params["W_K"], params["b_K"]) + lora(key,   params["A_K"], params["B_K"])
        V = lin(value, params["W_V"], params["b_V"]) + lora(value, params["A_V"], params["B_V"])

        scores = jnp.einsum("bqe,bke->bqk", Q, K) / (E ** 0.5)
        attn = jax.nn.softmax(scores, axis=-1)
        context = jnp.einsum("bqk,bke->bqe", attn, V)
        return lin(context, params["W_O"], params["b_O"])


# --------------------------------------------------------------------------
# Test harness
# --------------------------------------------------------------------------
def make_params(key, embed_dim, r):
    ks = jax.random.split(key, 14)
    bound = 1.0 / np.sqrt(embed_dim)

    def lin_w(k):  # rough stand-in for torch Linear default init
        return jax.random.uniform(k, (embed_dim, embed_dim), jnp.float32, -bound, bound)

    def lin_b(k):
        return jax.random.uniform(k, (1, embed_dim), jnp.float32, -bound, bound)

    # A ~ N(0, 0.02) as in the module.  The module inits B to zeros; we use
    # small non-zero B here so the test actually exercises the LoRA folding.
    return {
        "W_Q": lin_w(ks[0]), "b_Q": lin_b(ks[1]),
        "W_K": lin_w(ks[2]), "b_K": lin_b(ks[3]),
        "W_V": lin_w(ks[4]), "b_V": lin_b(ks[5]),
        "W_O": lin_w(ks[6]), "b_O": lin_b(ks[7]),
        "A_Q": 0.02 * jax.random.normal(ks[8],  (r, embed_dim), jnp.float32),
        "B_Q": 0.02 * jax.random.normal(ks[9],  (embed_dim, r), jnp.float32),
        "A_K": 0.02 * jax.random.normal(ks[10], (r, embed_dim), jnp.float32),
        "B_K": 0.02 * jax.random.normal(ks[11], (embed_dim, r), jnp.float32),
        "A_V": 0.02 * jax.random.normal(ks[12], (r, embed_dim), jnp.float32),
        "B_V": 0.02 * jax.random.normal(ks[13], (embed_dim, r), jnp.float32),
    }


if __name__ == "__main__":
    B, S, E, r = 2, 8, 32, 4
    key = jax.random.PRNGKey(0)
    kq, kk, kv, kp = jax.random.split(key, 4)

    query = jax.random.normal(kq, (B, S, E), jnp.float32)
    key_t = jax.random.normal(kk, (B, S, E), jnp.float32)
    value = jax.random.normal(kv, (B, S, E), jnp.float32)
    params = make_params(kp, E, r)

    packed = pack_params(params)            # one-time weight packing / padding
    out = lora_attention(query, key_t, value, packed)
    out = jax.block_until_ready(out)

    ref = lora_attention_ref(query, key_t, value, params)
    # Tolerance accounts for bf16 MXU inputs and the approximate (EUP)
    # softmax reciprocal vs. the full-f32 reference.
    np.testing.assert_allclose(np.asarray(out), np.asarray(ref), rtol=3e-2, atol=3e-2)

    print("KERNEL_OK")
</pallas_src>

<mosaic_0001>
module attributes {stable_mosaic.version = 11 : i64} {
  func.func @lora_attn_kernel(%arg0: i32, %arg1: memref<8x128xf32, #tpu.memory_space<vmem>>, %arg2: memref<8x128xf32, #tpu.memory_space<vmem>>, %arg3: memref<8x128xf32, #tpu.memory_space<vmem>>, %arg4: memref<128x128xbf16, #tpu.memory_space<vmem>>, %arg5: memref<1x128xf32, #tpu.memory_space<vmem>>, %arg6: memref<128x128xbf16, #tpu.memory_space<vmem>>, %arg7: memref<1x128xf32, #tpu.memory_space<vmem>>, %arg8: memref<128x128xbf16, #tpu.memory_space<vmem>>, %arg9: memref<1x128xf32, #tpu.memory_space<vmem>>, %arg10: memref<128x128xbf16, #tpu.memory_space<vmem>>, %arg11: memref<1x128xf32, #tpu.memory_space<vmem>>, %arg12: memref<8x128xf32, #tpu.memory_space<vmem>>) attributes {dimension_semantics = [#tpu.dimension_semantics<parallel>], iteration_bounds = array<i64: 2>, scalar_prefetch = 0 : i64, scratch_operands = 0 : i64, tpu.core_type = #tpu.core_type<tc>, window_params = [{transform_indices = @transform_0, window_bounds = array<i64: 8, 128>}, {transform_indices = @transform_1, window_bounds = array<i64: 8, 128>}, {transform_indices = @transform_2, window_bounds = array<i64: 8, 128>}, {pipeline_mode = #tpu.pipeline_mode<synchronous>, transform_indices = @transform_3, window_bounds = array<i64: 128, 128>}, {pipeline_mode = #tpu.pipeline_mode<synchronous>, transform_indices = @transform_4, window_bounds = array<i64: 1, 128>}, {pipeline_mode = #tpu.pipeline_mode<synchronous>, transform_indices = @transform_5, window_bounds = array<i64: 128, 128>}, {pipeline_mode = #tpu.pipeline_mode<synchronous>, transform_indices = @transform_6, window_bounds = array<i64: 1, 128>}, {pipeline_mode = #tpu.pipeline_mode<synchronous>, transform_indices = @transform_7, window_bounds = array<i64: 128, 128>}, {pipeline_mode = #tpu.pipeline_mode<synchronous>, transform_indices = @transform_8, window_bounds = array<i64: 1, 128>}, {pipeline_mode = #tpu.pipeline_mode<synchronous>, transform_indices = @transform_9, window_bounds = array<i64: 128, 128>}, {pipeline_mode = #tpu.pipeline_mode<synchronous>, transform_indices = @transform_10, window_bounds = array<i64: 1, 128>}, {transform_indices = @transform_11, window_bounds = array<i64: 8, 128>}]} {
    %c0 = arith.constant 0 : index
    %c0_0 = arith.constant 0 : index
    %0 = vector.load %arg1[%c0, %c0_0] : memref<8x128xf32, #tpu.memory_space<vmem>>, vector<8x128xf32>
    %1 = arith.truncf %0 : vector<8x128xf32> to vector<8x128xbf16>
    %c0_1 = arith.constant 0 : index
    %c0_2 = arith.constant 0 : index
    %2 = vector.load %arg4[%c0_1, %c0_2] : memref<128x128xbf16, #tpu.memory_space<vmem>>, vector<128x128xbf16>
    %cst = arith.constant dense<0.000000e+00> : vector<8x128xf32>
    %3 = tpu.matmul %1, %2, %cst {dimension_numbers = #tpu.dot_dimension_numbers<[1], [0], [0], [1], [0, 0, 1, 1], [], []>} : vector<8x128xbf16>, vector<128x128xbf16>, vector<8x128xf32> -> vector<8x128xf32>
    %c0_3 = arith.constant 0 : index
    %c0_4 = arith.constant 0 : index
    %4 = vector.load %arg5[%c0_3, %c0_4] : memref<1x128xf32, #tpu.memory_space<vmem>>, vector<1x128xf32>
    %5 = vector.broadcast %4 : vector<1x128xf32> to vector<8x128xf32>
    %6 = arith.addf %3, %5 : vector<8x128xf32>
    %7 = vector.shape_cast %6 : vector<8x128xf32> to vector<1x8x128xf32>
    %c0_5 = arith.constant 0 : index
    %c0_6 = arith.constant 0 : index
    %8 = vector.load %arg2[%c0_5, %c0_6] : memref<8x128xf32, #tpu.memory_space<vmem>>, vector<8x128xf32>
    %9 = arith.truncf %8 : vector<8x128xf32> to vector<8x128xbf16>
    %c0_7 = arith.constant 0 : index
    %c0_8 = arith.constant 0 : index
    %10 = vector.load %arg6[%c0_7, %c0_8] : memref<128x128xbf16, #tpu.memory_space<vmem>>, vector<128x128xbf16>
    %cst_9 = arith.constant dense<0.000000e+00> : vector<8x128xf32>
    %11 = tpu.matmul %9, %10, %cst_9 {dimension_numbers = #tpu.dot_dimension_numbers<[1], [0], [0], [1], [0, 0, 1, 1], [], []>} : vector<8x128xbf16>, vector<128x128xbf16>, vector<8x128xf32> -> vector<8x128xf32>
    %c0_10 = arith.constant 0 : index
    %c0_11 = arith.constant 0 : index
    %12 = vector.load %arg7[%c0_10, %c0_11] : memref<1x128xf32, #tpu.memory_space<vmem>>, vector<1x128xf32>
    %13 = vector.broadcast %12 : vector<1x128xf32> to vector<8x128xf32>
    %14 = arith.addf %11, %13 : vector<8x128xf32>
    %15 = vector.shape_cast %14 : vector<8x128xf32> to vector<1x8x128xf32>
    %c0_12 = arith.constant 0 : index
    %c0_13 = arith.constant 0 : index
    %16 = vector.load %arg3[%c0_12, %c0_13] : memref<8x128xf32, #tpu.memory_space<vmem>>, vector<8x128xf32>
    %17 = arith.truncf %16 : vector<8x128xf32> to vector<8x128xbf16>
    %c0_14 = arith.constant 0 : index
    %c0_15 = arith.constant 0 : index
    %18 = vector.load %arg8[%c0_14, %c0_15] : memref<128x128xbf16, #tpu.memory_space<vmem>>, vector<128x128xbf16>
    %cst_16 = arith.constant dense<0.000000e+00> : vector<8x128xf32>
    %19 = tpu.matmul %17, %18, %cst_16 {dimension_numbers = #tpu.dot_dimension_numbers<[1], [0], [0], [1], [0, 0, 1, 1], [], []>} : vector<8x128xbf16>, vector<128x128xbf16>, vector<8x128xf32> -> vector<8x128xf32>
    %c0_17 = arith.constant 0 : index
    %c0_18 = arith.constant 0 : index
    %20 = vector.load %arg9[%c0_17, %c0_18] : memref<1x128xf32, #tpu.memory_space<vmem>>, vector<1x128xf32>
    %21 = vector.broadcast %20 : vector<1x128xf32> to vector<8x128xf32>
    %22 = arith.addf %19, %21 : vector<8x128xf32>
    %23 = vector.shape_cast %22 : vector<8x128xf32> to vector<1x8x128xf32>
    %24 = arith.truncf %7 : vector<1x8x128xf32> to vector<1x8x128xbf16>
    %25 = arith.truncf %15 : vector<1x8x128xf32> to vector<1x8x128xbf16>
    "tpu.trace_start"() <{level = 10 : i32, message = "bqe,bke->bqk"}> : () -> ()
    %cst_19 = arith.constant dense<0.000000e+00> : vector<1x8x8xf32>
    %26 = tpu.matmul %24, %25, %cst_19 {dimension_numbers = #tpu.dot_dimension_numbers<[2], [2], [1], [1], [0, 0, 0, 1, 1, 1], [0], [0]>} : vector<1x8x128xbf16>, vector<1x8x128xbf16>, vector<1x8x8xf32> -> vector<1x8x8xf32>
    "tpu.trace_stop"() : () -> ()
    %cst_20 = arith.constant dense<0xFF800000> : vector<1x8xf32>
    %27 = vector.multi_reduction <maximumf>, %26, %cst_20 [2] : vector<1x8x8xf32> to vector<1x8xf32>
    %28 = vector.shape_cast %27 : vector<1x8xf32> to vector<1x8x1xf32>
    %29 = vector.broadcast %28 : vector<1x8x1xf32> to vector<1x8x8xf32>
    %30 = arith.subf %26, %29 : vector<1x8x8xf32>
    %31 = math.exp %30 : vector<1x8x8xf32>
    %cst_21 = arith.constant dense<0.000000e+00> : vector<1x8xf32>
    %32 = vector.multi_reduction <add>, %31, %cst_21 [2] : vector<1x8x8xf32> to vector<1x8xf32>
    %33 = vector.shape_cast %32 : vector<1x8xf32> to vector<1x8x1xf32>
    %34 = tpu.reciprocal %33 {approx = true} : vector<1x8x1xf32> -> vector<1x8x1xf32>
    %35 = vector.broadcast %34 : vector<1x8x1xf32> to vector<1x8x8xf32>
    %36 = arith.mulf %31, %35 : vector<1x8x8xf32>
    %37 = arith.truncf %36 : vector<1x8x8xf32> to vector<1x8x8xbf16>
    %38 = arith.truncf %23 : vector<1x8x128xf32> to vector<1x8x128xbf16>
    "tpu.trace_start"() <{level = 10 : i32, message = "bqk,bke->bqe"}> : () -> ()
    %cst_22 = arith.constant dense<0.000000e+00> : vector<1x8x128xf32>
    %39 = tpu.matmul %37, %38, %cst_22 {dimension_numbers = #tpu.dot_dimension_numbers<[2], [1], [1], [2], [0, 0, 0, 1, 1, 2], [0], [0]>} : vector<1x8x8xbf16>, vector<1x8x128xbf16>, vector<1x8x128xf32> -> vector<1x8x128xf32>
    "tpu.trace_stop"() : () -> ()
    %40 = vector.shape_cast %39 : vector<1x8x128xf32> to vector<8x128xf32>
    %41 = arith.truncf %40 : vector<8x128xf32> to vector<8x128xbf16>
    %c0_23 = arith.constant 0 : index
    %c0_24 = arith.constant 0 : index
    %42 = vector.load %arg10[%c0_23, %c0_24] : memref<128x128xbf16, #tpu.memory_space<vmem>>, vector<128x128xbf16>
    %cst_25 = arith.constant dense<0.000000e+00> : vector<8x128xf32>
    %43 = tpu.matmul %41, %42, %cst_25 {dimension_numbers = #tpu.dot_dimension_numbers<[1], [0], [0], [1], [0, 0, 1, 1], [], []>} : vector<8x128xbf16>, vector<128x128xbf16>, vector<8x128xf32> -> vector<8x128xf32>
    %c0_26 = arith.constant 0 : index
    %c0_27 = arith.constant 0 : index
    %44 = vector.load %arg11[%c0_26, %c0_27] : memref<1x128xf32, #tpu.memory_space<vmem>>, vector<1x128xf32>
    %45 = vector.broadcast %44 : vector<1x128xf32> to vector<8x128xf32>
    %46 = arith.addf %43, %45 : vector<8x128xf32>
    %c0_28 = arith.constant 0 : index
    %c0_29 = arith.constant 0 : index
    %47 = vector.load %arg12[%c0_28, %c0_29] : memref<8x128xf32, #tpu.memory_space<vmem>>, vector<8x128xf32>
    tpu.vector_store %arg12[%c0_28, %c0_29], %46 {strides = array<i32>} : memref<8x128xf32, #tpu.memory_space<vmem>>, vector<8x128xf32>,
    return
  }
  func.func @transform_0(%arg0: i32) -> (i32, i32) {
    %c0_i32 = arith.constant 0 : i32
    %c0_i32_0 = arith.constant 0 : i32
    return %arg0, %c0_i32 : i32, i32
  }
  func.func @transform_1(%arg0: i32) -> (i32, i32) {
    %c0_i32 = arith.constant 0 : i32
    %c0_i32_0 = arith.constant 0 : i32
    return %arg0, %c0_i32 : i32, i32
  }
  func.func @transform_2(%arg0: i32) -> (i32, i32) {
    %c0_i32 = arith.constant 0 : i32
    %c0_i32_0 = arith.constant 0 : i32
    return %arg0, %c0_i32 : i32, i32
  }
  func.func @transform_3(%arg0: i32) -> (i32, i32) {
    %c0_i32 = arith.constant 0 : i32
    %c0_i32_0 = arith.constant 0 : i32
    %c0_i32_1 = arith.constant 0 : i32
    return %c0_i32, %c0_i32_0 : i32, i32
  }
  func.func @transform_4(%arg0: i32) -> (i32, i32) {
    %c0_i32 = arith.constant 0 : i32
    %c0_i32_0 = arith.constant 0 : i32
    %c0_i32_1 = arith.constant 0 : i32
    return %c0_i32, %c0_i32_0 : i32, i32
  }
  func.func @transform_5(%arg0: i32) -> (i32, i32) {
    %c0_i32 = arith.constant 0 : i32
    %c0_i32_0 = arith.constant 0 : i32
    %c0_i32_1 = arith.constant 0 : i32
    return %c0_i32, %c0_i32_0 : i32, i32
  }
  func.func @transform_6(%arg0: i32) -> (i32, i32) {
    %c0_i32 = arith.constant 0 : i32
    %c0_i32_0 = arith.constant 0 : i32
    %c0_i32_1 = arith.constant 0 : i32
    return %c0_i32, %c0_i32_0 : i32, i32
  }
  func.func @transform_7(%arg0: i32) -> (i32, i32) {
    %c0_i32 = arith.constant 0 : i32
    %c0_i32_0 = arith.constant 0 : i32
    %c0_i32_1 = arith.constant 0 : i32
    return %c0_i32, %c0_i32_0 : i32, i32
  }
  func.func @transform_8(%arg0: i32) -> (i32, i32) {
    %c0_i32 = arith.constant 0 : i32
    %c0_i32_0 = arith.constant 0 : i32
    %c0_i32_1 = arith.constant 0 : i32
    return %c0_i32, %c0_i32_0 : i32, i32
  }
  func.func @transform_9(%arg0: i32) -> (i32, i32) {
    %c0_i32 = arith.constant 0 : i32
    %c0_i32_0 = arith.constant 0 : i32
    %c0_i32_1 = arith.constant 0 : i32
    return %c0_i32, %c0_i32_0 : i32, i32
  }
  func.func @transform_10(%arg0: i32) -> (i32, i32) {
    %c0_i32 = arith.constant 0 : i32
    %c0_i32_0 = arith.constant 0 : i32
    %c0_i32_1 = arith.constant 0 : i32
    return %c0_i32, %c0_i32_0 : i32, i32
  }
  func.func @transform_11(%arg0: i32) -> (i32, i32) {
    %c0_i32 = arith.constant 0 : i32
    %c0_i32_0 = arith.constant 0 : i32
    return %arg0, %c0_i32 : i32, i32
  }
}

module attributes {stable_mosaic.version = 11 : i64} {
  func.func @lora_attn_kernel(%arg0: i32, %arg1: memref<8x128xf32, #tpu.memory_space<vmem>>, %arg2: memref<8x128xf32, #tpu.memory_space<vmem>>, %arg3: memref<8x128xf32, #tpu.memory_space<vmem>>, %arg4: memref<128x128xbf16, #tpu.memory_space<vmem>>, %arg5: memref<1x128xf32, #tpu.memory_space<vmem>>, %arg6: memref<128x128xbf16, #tpu.memory_space<vmem>>, %arg7: memref<1x128xf32, #tpu.memory_space<vmem>>, %arg8: memref<128x128xbf16, #tpu.memory_space<vmem>>, %arg9: memref<1x128xf32, #tpu.memory_space<vmem>>, %arg10: memref<128x128xbf16, #tpu.memory_space<vmem>>, %arg11: memref<1x128xf32, #tpu.memory_space<vmem>>, %arg12: memref<8x128xf32, #tpu.memory_space<vmem>>) attributes {dimension_semantics = [#tpu.dimension_semantics<parallel>], iteration_bounds = array<i64: 2>, scalar_prefetch = 0 : i64, scratch_operands = 0 : i64, tpu.core_type = #tpu.core_type<tc>, window_params = [{transform_indices = @transform_0, window_bounds = array<i64: 8, 128>}, {transform_indices = @transform_1, window_bounds = array<i64: 8, 128>}, {transform_indices = @transform_2, window_bounds = array<i64: 8, 128>}, {pipeline_mode = #tpu.pipeline_mode<synchronous>, transform_indices = @transform_3, window_bounds = array<i64: 128, 128>}, {pipeline_mode = #tpu.pipeline_mode<synchronous>, transform_indices = @transform_4, window_bounds = array<i64: 1, 128>}, {pipeline_mode = #tpu.pipeline_mode<synchronous>, transform_indices = @transform_5, window_bounds = array<i64: 128, 128>}, {pipeline_mode = #tpu.pipeline_mode<synchronous>, transform_indices = @transform_6, window_bounds = array<i64: 1, 128>}, {pipeline_mode = #tpu.pipeline_mode<synchronous>, transform_indices = @transform_7, window_bounds = array<i64: 128, 128>}, {pipeline_mode = #tpu.pipeline_mode<synchronous>, transform_indices = @transform_8, window_bounds = array<i64: 1, 128>}, {pipeline_mode = #tpu.pipeline_mode<synchronous>, transform_indices = @transform_9, window_bounds = array<i64: 128, 128>}, {pipeline_mode = #tpu.pipeline_mode<synchronous>, transform_indices = @transform_10, window_bounds = array<i64: 1, 128>}, {transform_indices = @transform_11, window_bounds = array<i64: 8, 128>}]} {
    %c0 = arith.constant 0 : index
    %c0_0 = arith.constant 0 : index
    %0 = vector.load %arg1[%c0, %c0_0] : memref<8x128xf32, #tpu.memory_space<vmem>>, vector<8x128xf32>
    %1 = arith.truncf %0 : vector<8x128xf32> to vector<8x128xbf16>
    %c0_1 = arith.constant 0 : index
    %c0_2 = arith.constant 0 : index
    %2 = vector.load %arg4[%c0_1, %c0_2] : memref<128x128xbf16, #tpu.memory_space<vmem>>, vector<128x128xbf16>
    %cst = arith.constant dense<0.000000e+00> : vector<8x128xf32>
    %3 = tpu.matmul %1, %2, %cst {dimension_numbers = #tpu.dot_dimension_numbers<[1], [0], [0], [1], [0, 0, 1, 1], [], []>} : vector<8x128xbf16>, vector<128x128xbf16>, vector<8x128xf32> -> vector<8x128xf32>
    %c0_3 = arith.constant 0 : index
    %c0_4 = arith.constant 0 : index
    %4 = vector.load %arg5[%c0_3, %c0_4] : memref<1x128xf32, #tpu.memory_space<vmem>>, vector<1x128xf32>
    %5 = vector.broadcast %4 : vector<1x128xf32> to vector<8x128xf32>
    %6 = arith.addf %3, %5 : vector<8x128xf32>
    %7 = vector.shape_cast %6 : vector<8x128xf32> to vector<1x8x128xf32>
    %c0_5 = arith.constant 0 : index
    %c0_6 = arith.constant 0 : index
    %8 = vector.load %arg2[%c0_5, %c0_6] : memref<8x128xf32, #tpu.memory_space<vmem>>, vector<8x128xf32>
    %9 = arith.truncf %8 : vector<8x128xf32> to vector<8x128xbf16>
    %c0_7 = arith.constant 0 : index
    %c0_8 = arith.constant 0 : index
    %10 = vector.load %arg6[%c0_7, %c0_8] : memref<128x128xbf16, #tpu.memory_space<vmem>>, vector<128x128xbf16>
    %cst_9 = arith.constant dense<0.000000e+00> : vector<8x128xf32>
    %11 = tpu.matmul %9, %10, %cst_9 {dimension_numbers = #tpu.dot_dimension_numbers<[1], [0], [0], [1], [0, 0, 1, 1], [], []>} : vector<8x128xbf16>, vector<128x128xbf16>, vector<8x128xf32> -> vector<8x128xf32>
    %c0_10 = arith.constant 0 : index
    %c0_11 = arith.constant 0 : index
    %12 = vector.load %arg7[%c0_10, %c0_11] : memref<1x128xf32, #tpu.memory_space<vmem>>, vector<1x128xf32>
    %13 = vector.broadcast %12 : vector<1x128xf32> to vector<8x128xf32>
    %14 = arith.addf %11, %13 : vector<8x128xf32>
    %15 = vector.shape_cast %14 : vector<8x128xf32> to vector<1x8x128xf32>
    %c0_12 = arith.constant 0 : index
    %c0_13 = arith.constant 0 : index
    %16 = vector.load %arg3[%c0_12, %c0_13] : memref<8x128xf32, #tpu.memory_space<vmem>>, vector<8x128xf32>
    %17 = arith.truncf %16 : vector<8x128xf32> to vector<8x128xbf16>
    %c0_14 = arith.constant 0 : index
    %c0_15 = arith.constant 0 : index
    %18 = vector.load %arg8[%c0_14, %c0_15] : memref<128x128xbf16, #tpu.memory_space<vmem>>, vector<128x128xbf16>
    %cst_16 = arith.constant dense<0.000000e+00> : vector<8x128xf32>
    %19 = tpu.matmul %17, %18, %cst_16 {dimension_numbers = #tpu.dot_dimension_numbers<[1], [0], [0], [1], [0, 0, 1, 1], [], []>} : vector<8x128xbf16>, vector<128x128xbf16>, vector<8x128xf32> -> vector<8x128xf32>
    %c0_17 = arith.constant 0 : index
    %c0_18 = arith.constant 0 : index
    %20 = vector.load %arg9[%c0_17, %c0_18] : memref<1x128xf32, #tpu.memory_space<vmem>>, vector<1x128xf32>
    %21 = vector.broadcast %20 : vector<1x128xf32> to vector<8x128xf32>
    %22 = arith.addf %19, %21 : vector<8x128xf32>
    %23 = vector.shape_cast %22 : vector<8x128xf32> to vector<1x8x128xf32>
    %24 = arith.truncf %7 : vector<1x8x128xf32> to vector<1x8x128xbf16>
    %25 = arith.truncf %15 : vector<1x8x128xf32> to vector<1x8x128xbf16>
    "tpu.trace_start"() <{level = 10 : i32, message = "bqe,bke->bqk"}> : () -> ()
    %cst_19 = arith.constant dense<0.000000e+00> : vector<1x8x8xf32>
    %26 = tpu.matmul %24, %25, %cst_19 {dimension_numbers = #tpu.dot_dimension_numbers<[2], [2], [1], [1], [0, 0, 0, 1, 1, 1], [0], [0]>} : vector<1x8x128xbf16>, vector<1x8x128xbf16>, vector<1x8x8xf32> -> vector<1x8x8xf32>
    "tpu.trace_stop"() : () -> ()
    %cst_20 = arith.constant dense<0xFF800000> : vector<1x8xf32>
    %27 = vector.multi_reduction <maximumf>, %26, %cst_20 [2] : vector<1x8x8xf32> to vector<1x8xf32>
    %28 = vector.shape_cast %27 : vector<1x8xf32> to vector<1x8x1xf32>
    %29 = vector.broadcast %28 : vector<1x8x1xf32> to vector<1x8x8xf32>
    %30 = arith.subf %26, %29 : vector<1x8x8xf32>
    %31 = math.exp %30 : vector<1x8x8xf32>
    %cst_21 = arith.constant dense<0.000000e+00> : vector<1x8xf32>
    %32 = vector.multi_reduction <add>, %31, %cst_21 [2] : vector<1x8x8xf32> to vector<1x8xf32>
    %33 = vector.shape_cast %32 : vector<1x8xf32> to vector<1x8x1xf32>
    %34 = tpu.reciprocal %33 {approx = true} : vector<1x8x1xf32> -> vector<1x8x1xf32>
    %35 = vector.broadcast %34 : vector<1x8x1xf32> to vector<1x8x8xf32>
    %36 = arith.mulf %31, %35 : vector<1x8x8xf32>
    %37 = arith.truncf %36 : vector<1x8x8xf32> to vector<1x8x8xbf16>
    %38 = arith.truncf %23 : vector<1x8x128xf32> to vector<1x8x128xbf16>
    "tpu.trace_start"() <{level = 10 : i32, message = "bqk,bke->bqe"}> : () -> ()
    %cst_22 = arith.constant dense<0.000000e+00> : vector<1x8x128xf32>
    %39 = tpu.matmul %37, %38, %cst_22 {dimension_numbers = #tpu.dot_dimension_numbers<[2], [1], [1], [2], [0, 0, 0, 1, 1, 2], [0], [0]>} : vector<1x8x8xbf16>, vector<1x8x128xbf16>, vector<1x8x128xf32> -> vector<1x8x128xf32>
    "tpu.trace_stop"() : () -> ()
    %40 = vector.shape_cast %39 : vector<1x8x128xf32> to vector<8x128xf32>
    %41 = arith.truncf %40 : vector<8x128xf32> to vector<8x128xbf16>
    %c0_23 = arith.constant 0 : index
    %c0_24 = arith.constant 0 : index
    %42 = vector.load %arg10[%c0_23, %c0_24] : memref<128x128xbf16, #tpu.memory_space<vmem>>, vector<128x128xbf16>
    %cst_25 = arith.constant dense<0.000000e+00> : vector<8x128xf32>
    %43 = tpu.matmul %41, %42, %cst_25 {dimension_numbers = #tpu.dot_dimension_numbers<[1], [0], [0], [1], [0, 0, 1, 1], [], []>} : vector<8x128xbf16>, vector<128x128xbf16>, vector<8x128xf32> -> vector<8x128xf32>
    %c0_26 = arith.constant 0 : index
    %c0_27 = arith.constant 0 : index
    %44 = vector.load %arg11[%c0_26, %c0_27] : memref<1x128xf32, #tpu.memory_space<vmem>>, vector<1x128xf32>
    %45 = vector.broadcast %44 : vector<1x128xf32> to vector<8x128xf32>
    %46 = arith.addf %43, %45 : vector<8x128xf32>
    %c0_28 = arith.constant 0 : index
    %c0_29 = arith.constant 0 : index
    %47 = vector.load %arg12[%c0_28, %c0_29] : memref<8x128xf32, #tpu.memory_space<vmem>>, vector<8x128xf32>
    tpu.vector_store %arg12[%c0_28, %c0_29], %46 {strides = array<i32>} : memref<8x128xf32, #tpu.memory_space<vmem>>, vector<8x128xf32>,
    return
  }
  func.func @transform_0(%arg0: i32) -> (i32, i32) {
    %c0_i32 = arith.constant 0 : i32
    %c0_i32_0 = arith.constant 0 : i32
    return %arg0, %c0_i32 : i32, i32
  }
  func.func @transform_1(%arg0: i32) -> (i32, i32) {
    %c0_i32 = arith.constant 0 : i32
    %c0_i32_0 = arith.constant 0 : i32
    return %arg0, %c0_i32 : i32, i32
  }
  func.func @transform_2(%arg0: i32) -> (i32, i32) {
    %c0_i32 = arith.constant 0 : i32
    %c0_i32_0 = arith.constant 0 : i32
    return %arg0, %c0_i32 : i32, i32
  }
  func.func @transform_3(%arg0: i32) -> (i32, i32) {
    %c0_i32 = arith.constant 0 : i32
    %c0_i32_0 = arith.constant 0 : i32
    %c0_i32_1 = arith.constant 0 : i32
    return %c0_i32, %c0_i32_0 : i32, i32
  }
  func.func @transform_4(%arg0: i32) -> (i32, i32) {
    %c0_i32 = arith.constant 0 : i32
    %c0_i32_0 = arith.constant 0 : i32
    %c0_i32_1 = arith.constant 0 : i32
    return %c0_i32, %c0_i32_0 : i32, i32
  }
  func.func @transform_5(%arg0: i32) -> (i32, i32) {
    %c0_i32 = arith.constant 0 : i32
    %c0_i32_0 = arith.constant 0 : i32
    %c0_i32_1 = arith.constant 0 : i32
    return %c0_i32, %c0_i32_0 : i32, i32
  }
  func.func @transform_6(%arg0: i32) -> (i32, i32) {
    %c0_i32 = arith.constant 0 : i32
    %c0_i32_0 = arith.constant 0 : i32
    %c0_i32_1 = arith.constant 0 : i32
    return %c0_i32, %c0_i32_0 : i32, i32
  }
  func.func @transform_7(%arg0: i32) -> (i32, i32) {
    %c0_i32 = arith.constant 0 : i32
    %c0_i32_0 = arith.constant 0 : i32
    %c0_i32_1 = arith.constant 0 : i32
    return %c0_i32, %c0_i32_0 : i32, i32
  }
  func.func @transform_8(%arg0: i32) -> (i32, i32) {
    %c0_i32 = arith.constant 0 : i32
    %c0_i32_0 = arith.constant 0 : i32
    %c0_i32_1 = arith.constant 0 : i32
    return %c0_i32, %c0_i32_0 : i32, i32
  }
  func.func @transform_9(%arg0: i32) -> (i32, i32) {
    %c0_i32 = arith.constant 0 : i32
    %c0_i32_0 = arith.constant 0 : i32
    %c0_i32_1 = arith.constant 0 : i32
    return %c0_i32, %c0_i32_0 : i32, i32
  }
  func.func @transform_10(%arg0: i32) -> (i32, i32) {
    %c0_i32 = arith.constant 0 : i32
    %c0_i32_0 = arith.constant 0 : i32
    %c0_i32_1 = arith.constant 0 : i32
    return %c0_i32, %c0_i32_0 : i32, i32
  }
  func.func @transform_11(%arg0: i32) -> (i32, i32) {
    %c0_i32 = arith.constant 0 : i32
    %c0_i32_0 = arith.constant 0 : i32
    return %arg0, %c0_i32 : i32, i32
  }
}

</mosaic_0001>

<bundles_post_ra>
// kernel: tpu_custom_call.1
= control target key start
LH: loop header
LB: loop body
LE: loop exit
PB: predicated region body
PF: predicated region fallthrough
CT: control target
= control target key end

     0   :  { %s2363_s0 = inlined_call_operand.hbm [shape: f32[16,128], index: 0, kind: input, shape index: {}]   ;;  %s2364_s1 = inlined_call_operand.hbm [shape: f32[16,128], index: 1, kind: input, shape index: {}]   ;;  %s2365_s2 = inlined_call_operand.hbm [shape: f32[16,128], index: 2, kind: input, shape index: {}]   ;;  %s2366_s3 = inlined_call_operand.hbm [shape: bf16[128,128], index: 3, kind: input, shape index: {}]   ;;  %s2367_s4 = inlined_call_operand.vmem [shape: f32[1,128], index: 4, kind: input, shape index: {}]   ;;  %s2368_s5 = inlined_call_operand.hbm [shape: bf16[128,128], index: 5, kind: input, shape index: {}]   ;;  %s2369_s6 = inlined_call_operand.vmem [shape: f32[1,128], index: 6, kind: input, shape index: {}]   ;;  %s2370_s7 = inlined_call_operand.hbm [shape: bf16[128,128], index: 7, kind: input, shape index: {}]   ;;  %s2371_s8 = inlined_call_operand.vmem [shape: f32[1,128], index: 8, kind: input, shape index: {}]   ;;  %s2372_s9 = inlined_call_operand.hbm [shape: bf16[128,128], index: 9, kind: input, shape index: {}]   ;;  %s2373_s10 = inlined_call_operand.vmem [shape: f32[1,128], index: 10, kind: input, shape index: {}]   ;;  %s2374_s11 = inlined_call_operand.hbm [shape: f32[16,128], index: 11, kind: output, shape index: {}]  }
   0x1   :  { %2400 = sst [smem:[#allocation26_spill]] %s2364_s1 }
   0x2   :  { %2401 = sst [smem:[#allocation27_spill]] %s2366_s3 }
   0x3   :  { %2402 = sst [smem:[#allocation28_spill]] %s2367_s4 }
   0x4   :  { %2403 = sst [smem:[#allocation29_spill]] %s2370_s7 }
   0x5   :  { %2404 = sst [smem:[#allocation30_spill]] %s2371_s8 }
   0x6   :  { %2405 = sst [smem:[#allocation31_spill]] %s2373_s10 }
   0x7   :  { %2406 = sst [smem:[#allocation32_spill]] %s2374_s11 }
   0x8   :  { %16 = vsyncpa [#allocation3], 0 }
   0x9   :  { %18 = vsyncpa [#allocation3 + $0x1], 0 }
   0xa   :  { %19 = vsyncpa [#allocation6], 0 }
   0xb   :  { %21 = vsyncpa [#allocation6 + $0x1], 0 }
   0xc   :  { %22 = vsyncpa [#allocation9], 0 }
   0xd   :  { %23 = vsyncpa [#allocation12], 0 }
   0xe   :  { %24 = vsyncpa [#allocation4], 0 }
   0xf   :  { %26 = vsyncpa [#allocation4 + $0x1], 0  ;;  %s1938_s17 = smov 0   ;;  %s1940_s18 = smov 0  }
  0x10   :  { %s1942_s19 = smov 0   ;;  %s1944_s20 = smov 0  }
  0x11 LB: > { %2407 = sst [smem:[#allocation20_spill]] %s1852_s17  ;;  %s1866_s21 = smov [#allocation8]   ;;  %s1864_s20 = sphi %s1944_s20, %s2449_s20   ;;  %s1860_s19 = sphi %s1942_s19, %s2453_s19   ;;  %s1856_s18 = sphi %s1940_s18, %s2452_s18   ;;  %s1852_s17 = sphi %s1938_s17, %s2451_s17  }
  0x12   : > { %2408 = sst [smem:[#allocation21_spill]] %s1864_s20  ;;  %s321_s22 = sshll.u32 %s1866_s21, 4  ;;  %s1964_s22 = int_to_ptr.vmem [resolvable:$true] %s321_s22 }
  0x13   : > { %s1959_s23 = sadd.s32 4294967295, %s1864_s20   ;;  %p1253_p0 = scmp.ge.s32.totalorder %s1864_s20, 1 }
  0x14   : > { %p2387_p1 = scmp.eq.s32.totalorder %s1959_s23, 0  ;;  %p309_p2 = scmp.lt.s32.totalorder %s1864_s20, 3 }
  0x15   : > { %s1867_s25 = smov [#allocation11]   ;;  %s2411_s3 = sld [smem:[#allocation27_spill]] }
  0x16   : > { %p1966_p3 = pnand %p1253_p0, %p309_p2  ;;  %s353_s26 = sshll.u32 %s1867_s25, 4  ;;  %s1979_s26 = int_to_ptr.vmem [resolvable:$true] %s353_s26 }
  0x18   : > { %s2409_s24 = scalar_select %p1966_p3, 1, 0 }
  0x19   : > { %p1471_p5 = pneg %p1966_p3 }
  0x1b   : > { %p1975_p6 = pnand %p1471_p5, %p2387_p1  ;;  %s1584_s30 = scalar_lea.hbm %s2411_s3, 1024 }
  0x1c   : > { %p1585_p7 = scmp.ne.s32.totalorder %s2411_s3, %s1584_s30  ;;  %p1591_p11 = scmp.lt.u32.totalorder %s1584_s30, %s2411_s3 }
  0x1d   : > { %s2410_s27 = scalar_select %p1975_p6, 1, 0 }
  0x1e   : > { %p1989_p8 = pneg %p1975_p6 }
  0x20   : > { %s2412_s14 = scalar_select %p1989_p8, 1, 0 }
  0x21   : > { %p1587_p9 = pnand %p1989_p8, %p1585_p7 }
  0x23   : > { %p1588_p10 = pneg %p1587_p9 }
  0x25   : > { %p1593_p12 = pnand %p1591_p11, %p1588_p10 }
  0x27   : > { %1596 = shalt.err (!%p1593_p12)
}
  0x28   : > { %s1597_s21 = scalar_lea.vmem %s1964_s22, 1024  ;;  %p1605_p5 = scmp.lt.s32.totalorder %s1964_s22, %s1964_s22 }
  0x29   : > { %p1598_p13 = scmp.ne.s32.totalorder %s1964_s22, %s1597_s21  ;;  %p1606_p4 = scmp.lt.s32.totalorder %s1597_s21, %s1597_s21 }
  0x2b   : > { %p1600_p0 = pnand %p1598_p13, %p1989_p8  ;;  %p1607_p7 = por %p1606_p4, %p1605_p5 }
  0x2d   : > { %p1601_p2 = pneg %p1600_p0 }
  0x2f   : > { %p1608_p9 = pnand %p1607_p7, %p1601_p2 }
  0x31   : > { %1611 = shalt.err (!%p1608_p9)
}
  0x32   : > { %s2377_s25 = smov 64   ;;  %s2379_s28 = smov 4  }
  0x33   : > { %1474 = dma.hbm_to_vmem [thread:$0]  (!%p1975_p6), %s2411_s3, 1024, %s1964_s22, [#allocation9], %s2377_s25, %s2377_s25, %s2379_s28  }
  0x34   : > { %s2413_s7 = sld [smem:[#allocation29_spill]] }
  0x3a   : > { %s1612_s15 = scalar_lea.hbm %s2413_s7, 1024 }
  0x3b   : > { %p1613_p4 = scmp.ne.s32.totalorder %s2413_s7, %s1612_s15  ;;  %p1619_p12 = scmp.lt.u32.totalorder %s1612_s15, %s2413_s7 }
  0x3d   : > { %p1615_p10 = pnand %p1613_p4, %p1989_p8 }
  0x3f   : > { %p1616_p11 = pneg %p1615_p10 }
  0x41   : > { %p1621_p13 = pnand %p1619_p12, %p1616_p11 }
  0x43   : > { %1624 = shalt.err (!%p1621_p13)
}
  0x44   : > { %s1625_s22 = scalar_lea.vmem %s1979_s26, 1024  ;;  %p1633_p7 = scmp.lt.s32.totalorder %s1979_s26, %s1979_s26 }
  0x45   : > { %p1626_p0 = scmp.ne.s32.totalorder %s1979_s26, %s1625_s22  ;;  %p1634_p9 = scmp.lt.s32.totalorder %s1625_s22, %s1625_s22 }
  0x47   : > { %p1628_p2 = pnand %p1626_p0, %p1989_p8  ;;  %p1635_p4 = por %p1634_p9, %p1633_p7 }
  0x49   : > { %p1629_p5 = pneg %p1628_p2 }
  0x4b   : > { %p1636_p10 = pnand %p1635_p4, %p1629_p5 }
  0x4d   : > { %1639 = shalt.err (!%p1636_p10)
}
  0x4e   : > { %1480 = dma.hbm_to_vmem [thread:$0]  (!%p1975_p6), %s2413_s7, 1024, %s1979_s26, [#allocation12], %s2377_s25, %s2377_s25, %s2379_s28  }
  0x4f   : > { %s1252_s29 = sadd.s32 4294967294, %s1864_s20   ;;  %s2041_s30 = sadd.s32 1, %s1864_s20  }
  0x50   : > { %2414 = sst [smem:[#allocation22_spill]] %s2041_s30  ;;  %s36_s12 = ssub.s32 %s1864_s20, %s2041_s30 }
  0x51   : > { %s39_s13 = sadd.s32 1, %s1860_s19  ;;  %p37_p11 = scmp.eq.s32.totalorder %s36_s12, 0 }
  0x52   : > { %p46_p12 = scmp.ne.s32.totalorder %s1860_s19, %s1856_s18  ;;  %p47_p13 = scmp.eq.s32.totalorder %s1864_s20, 0 }
  0x53   : > { %p52_p0 = scmp.ne.s32.totalorder %s1856_s18, %s1852_s17  ;;  %p296_p7 = scmp.eq.s32.totalorder %s1959_s23, 1 }
  0x54   : > { %s2052_s15 = scalar_select %p37_p11, %s1860_s19, %s39_s13  }
  0x55   : > { %p48_p2 = por %p47_p13, %p46_p12  ;;  %p2056_p5 = por %p2387_p1, %p52_p0 }
  0x56   : > { %2415 = sst [smem:[#allocation23_spill]] %s2052_s15  ;;  %p302_p9 = scmp.eq.s32.totalorder %s1252_s29, 1 }
  0x57   : > { %s2416_s16 = scalar_select %p2056_p5, 1, 0 }
  0x58   : > { %p1502_p4 = scmp.lt.s32.totalorder %s1864_s20, 2  ;;  %s2381_s26 = sand.u32 1, %s1860_s19  }
  0x59   : > { %p2063_p10 = por %p296_p7, %p46_p12  ;;  %p2067_p3 = por %p302_p9, %p52_p0 }
  0x5a   : > { %s2073_s10 = sshll.u32 %s2381_s26, 3  ;;  %s2076_s11 = sshll.u32 %s1864_s20, 7 }
  0x5b   : > { %s2417_s21 = scalar_select %p2063_p10, 1, 0 }
  0x5c   : > { %s2419_s22 = scalar_select %p2067_p3, 1, 0 }
  0x5d   : > { %2418 = sst [smem:[#allocation24_spill]] %s2417_s21  ;;  %p2078_p11 = pnand %p1502_p4, %p48_p2 }
  0x5e   : > { %2420 = sst [smem:[#allocation25_spill]] %s2419_s22  ;;  %s404_s29 = sand.u32 1, %s1864_s20  }
  0x5f   : > { %s2421_s12 = scalar_select %p2078_p11, 1, 0 }
  0x60   : > { %s2422_s1 = sld [smem:[#allocation26_spill]]  ;;  %s408_s26 = scalar_lea.vmem [#allocation5], %s2073_s10 }
  0x61   : > { %s415_s3 = sshll.u32 %s408_s26, 4  ;;  %s1870_s7 = smov [#allocation10]   ;;  %s2090_s3 = int_to_ptr.vmem [resolvable:$true] %s415_s3 }
  0x62   : > { %s2092_s15 = sshll.u32 %s1870_s7, 4  ;;  %s2094_s30 = scalar_lea.sflag [#allocation6], %s404_s29  ;;  %s338_s15 = int_to_ptr.vmem [resolvable:$true] %s2092_s15 }
  0x63   : > { %p2100_p13 = pneg %p2078_p11 }
  0x65   : > { %s2423_s25 = scalar_select %p2100_p13, 1, 0 }
  0x66   : > { %s2087_s28 = scalar_lea.hbm %s2422_s1, %s2076_s11  ;;  %s1645_s20 = scalar_lea.hbm %s2422_s1, 256 }
  0x67   : > { %s1640_s22 = scalar_lea.hbm %s2087_s28, 128  ;;  %p1646_p7 = scmp.lt.u32.totalorder %s2087_s28, %s2422_s1 }
  0x68   : > { %p1641_p12 = scmp.ne.s32.totalorder %s2087_s28, %s1640_s22  ;;  %p1647_p9 = scmp.lt.u32.totalorder %s1645_s20, %s1640_s22 }
  0x69   : > { %p1649_p1 = scmp.lt.u32.totalorder %s1640_s22, %s2087_s28 }
  0x6a   : > { %p1643_p0 = pnand %p2100_p13, %p1641_p12  ;;  %p1648_p4 = por %p1647_p9, %p1646_p7 }
  0x6c   : > { %p1644_p2 = pneg %p1643_p0  ;;  %p1650_p3 = por %p1649_p1, %p1648_p4 }
  0x6e   : > { %p1651_p10 = pnand %p1650_p3, %p1644_p2 }
  0x70   : > { %1654 = shalt.err (!%p1651_p10)
}
  0x71   : > { %s1655_s29 = scalar_lea.vmem %s2090_s3, 128  ;;  %s1871_s13 = smov [#allocation5]  }
  0x72   : > { %p1656_p12 = scmp.ne.s32.totalorder %s2090_s3, %s1655_s29  ;;  %s1660_s26 = sshll.u32 %s1871_s13, 4  ;;  %s1661_s26 = int_to_ptr.vmem [resolvable:$false] %s1660_s26 }
  0x73   : > { %s1662_s17 = scalar_lea.vmem %s1661_s26, 256  ;;  %p1663_p6 = scmp.lt.s32.totalorder %s2090_s3, %s1661_s26 }
  0x74   : > { %p1658_p0 = pnand %p1656_p12, %p2100_p13  ;;  %p1664_p8 = scmp.lt.s32.totalorder %s1662_s17, %s1655_s29 }
  0x76   : > { %p1659_p5 = pneg %p1658_p0  ;;  %p1665_p7 = por %p1664_p8, %p1663_p6 }
  0x78   : > { %p1666_p9 = pnand %p1665_p7, %p1659_p5 }
  0x7a   : > { %1669 = shalt.err (!%p1666_p9)
}
  0x7b   : > { %1490 = dma.hbm_to_vmem [thread:$0]  (!%p2078_p11), %s2087_s28, 128, %s2090_s3, %s2094_s30  }
  0x7c   : > { %s1670_s7 = scalar_lea.hbm %s2368_s5, 1024  ;;  %p2424_p3 = scmp.ne.s32.totalorder %s2412_s14, 0 }
  0x7d   : > { %p1671_p1 = scmp.ne.s32.totalorder %s2368_s5, %s1670_s7  ;;  %p1677_p5 = scmp.lt.u32.totalorder %s1670_s7, %s2368_s5 }
  0x7f   : > { %p1673_p6 = pnand %p1671_p1, %p2424_p3 }
  0x81   : > { %p1674_p8 = pneg %p1673_p6 }
  0x83   : > { %p1679_p10 = pnand %p1677_p5, %p1674_p8 }
  0x85   : > { %1682 = shalt.err (!%p1679_p10)
}
  0x86   : > { %s1683_s17 = scalar_lea.vmem %s338_s15, 1024  ;;  %p1691_p0 = scmp.lt.s32.totalorder %s338_s15, %s338_s15 }
  0x87   : > { %p1684_p2 = scmp.ne.s32.totalorder %s338_s15, %s1683_s17  ;;  %p1692_p7 = scmp.lt.s32.totalorder %s1683_s17, %s1683_s17 }
  0x89   : > { %p1686_p4 = pnand %p1684_p2, %p2424_p3  ;;  %p1693_p9 = por %p1692_p7, %p1691_p0 }
  0x8b   : > { %p1687_p12 = pneg %p1686_p4 }
  0x8d   : > { %p1694_p11 = pnand %p1693_p9, %p1687_p12 }
  0x8f   : > { %1697 = shalt.err (!%p1694_p11)
}
  0x90   : > { %p2425_p1 = scmp.ne.s32.totalorder %s2410_s27, 0  ;;  %s2426_s1 = smov 4  }
  0x91   : > { %s2427_s3 = smov 64   ;;  %s1872_s22 = smov [#allocation13]  }
  0x92   : > { %1477 = dma.hbm_to_vmem [thread:$0]  (!%p2425_p1), %s2368_s5, 1024, %s338_s15, [#allocation9], %s2427_s3, %s2427_s3, %s2426_s1  }
  0x93   : > { %s369_s7 = sshll.u32 %s1872_s22, 4  ;;  %s1698_s26 = scalar_lea.hbm %s2372_s9, 1024  ;;  %s370_s7 = int_to_ptr.vmem [resolvable:$true] %s369_s7 }
  0x94   : > { %p1699_p11 = scmp.ne.s32.totalorder %s2372_s9, %s1698_s26  ;;  %p1705_p5 = scmp.lt.u32.totalorder %s1698_s26, %s2372_s9 }
  0x96   : > { %p1701_p6 = pnand %p1699_p11, %p2424_p3 }
  0x98   : > { %p1702_p8 = pneg %p1701_p6 }
  0x9a   : > { %p1707_p10 = pnand %p1705_p5, %p1702_p8 }
  0x9c   : > { %1710 = shalt.err (!%p1707_p10)
}
  0x9d   : > { %s1711_s15 = scalar_lea.vmem %s370_s7, 1024  ;;  %p1719_p0 = scmp.lt.s32.totalorder %s370_s7, %s370_s7 }
  0x9e   : > { %p1712_p2 = scmp.ne.s32.totalorder %s370_s7, %s1711_s15  ;;  %p1720_p7 = scmp.lt.s32.totalorder %s1711_s15, %s1711_s15 }
  0xa0   : > { %p1714_p4 = pnand %p1712_p2, %p2424_p3  ;;  %p1721_p9 = por %p1720_p7, %p1719_p0 }
  0xa2   : > { %p1715_p12 = pneg %p1714_p4 }
  0xa4   : > { %p1722_p13 = pnand %p1721_p9, %p1715_p12 }
  0xa6   : > { %1725 = shalt.err (!%p1722_p13)
}
  0xa7   : > { %1483 = dma.hbm_to_vmem [thread:$0]  (!%p2425_p1), %s2372_s9, 1024, %s370_s7, [#allocation12], %s2427_s3, %s2427_s3, %s2426_s1  }
  0xa8   : > { %s2171_s28 = scalar_lea.hbm %s2363_s0, %s2076_s11  ;;  %s390_s27 = scalar_lea.vmem [#allocation2], %s2073_s10 }
  0xa9   : > { %s397_s20 = sshll.u32 %s390_s27, 4  ;;  %s2428_s22 = sand.u32 1, %s1860_s19   ;;  %s398_s20 = int_to_ptr.vmem [resolvable:$true] %s397_s20 }
  0xaa   : > { %s387_s13 = scalar_lea.sflag [#allocation3], %s2428_s22  ;;  %s1726_s29 = scalar_lea.hbm %s2171_s28, 128 }
  0xab   : > { %p1727_p13 = scmp.ne.s32.totalorder %s2171_s28, %s1726_s29  ;;  %p2429_p3 = scmp.ne.s32.totalorder %s2423_s25, 0 }
  0xac   : > { %s1731_s7 = scalar_lea.hbm %s2363_s0, 256  ;;  %p1732_p1 = scmp.lt.u32.totalorder %s2171_s28, %s2363_s0 }
  0xad   : > { %p1729_p11 = pnand %p1727_p13, %p2429_p3  ;;  %p1733_p8 = scmp.lt.u32.totalorder %s1731_s7, %s1726_s29 }
  0xae   : > { %p1735_p10 = scmp.lt.u32.totalorder %s1726_s29, %s2171_s28 }
  0xaf   : > { %p1730_p6 = pneg %p1729_p11  ;;  %p1734_p5 = por %p1733_p8, %p1732_p1 }
  0xb1   : > { %p1736_p2 = por %p1735_p10, %p1734_p5 }
  0xb3   : > { %p1737_p4 = pnand %p1736_p2, %p1730_p6 }
  0xb5   : > { %1740 = shalt.err (!%p1737_p4)
}
  0xb6   : > { %s1741_s15 = scalar_lea.vmem %s398_s20, 128  ;;  %s1873_s4 = smov [#allocation2]  }
  0xb7   : > { %p1742_p12 = scmp.ne.s32.totalorder %s398_s20, %s1741_s15  ;;  %s1746_s8 = sshll.u32 %s1873_s4, 4  ;;  %s1747_s8 = int_to_ptr.vmem [resolvable:$false] %s1746_s8 }
  0xb8   : > { %s1748_s14 = scalar_lea.vmem %s1747_s8, 256  ;;  %p1749_p9 = scmp.lt.s32.totalorder %s398_s20, %s1747_s8 }
  0xb9   : > { %p1744_p0 = pnand %p1742_p12, %p2429_p3  ;;  %p1750_p13 = scmp.lt.s32.totalorder %s1748_s14, %s1741_s15 }
  0xbb   : > { %p1745_p7 = pneg %p1744_p0  ;;  %p1751_p11 = por %p1750_p13, %p1749_p9 }
  0xbd   : > { %p1752_p1 = pnand %p1751_p11, %p1745_p7 }
  0xbf   : > { %1755 = shalt.err (!%p1752_p1)
}
  0xc0   : > { %p2430_p8 = scmp.ne.s32.totalorder %s2421_s12, 0  ;;  %s2197_s22 = scalar_lea.hbm %s2365_s2, %s2076_s11 }
  0xc1   : > { %s426_s29 = scalar_lea.vmem [#allocation7], %s2073_s10  ;;  %s1756_s3 = scalar_lea.hbm %s2197_s22, 128 }
  0xc2   : > { %1487 = dma.hbm_to_vmem [thread:$0]  (!%p2430_p8), %s2171_s28, 128, %s398_s20, %s387_s13  }
  0xc3   : > { %s433_s1 = sshll.u32 %s426_s29, 4  ;;  %p1757_p6 = scmp.ne.s32.totalorder %s2197_s22, %s1756_s3  ;;  %s434_s1 = int_to_ptr.vmem [resolvable:$true] %s433_s1 }
  0xc4   : > { %s1761_s28 = scalar_lea.hbm %s2365_s2, 256  ;;  %p1762_p2 = scmp.lt.u32.totalorder %s2197_s22, %s2365_s2 }
  0xc5   : > { %p1759_p5 = pnand %p1757_p6, %p2429_p3  ;;  %p1763_p4 = scmp.lt.u32.totalorder %s1761_s28, %s1756_s3 }
  0xc6   : > { %p1765_p0 = scmp.lt.u32.totalorder %s1756_s3, %s2197_s22 }
  0xc7   : > { %p1760_p10 = pneg %p1759_p5  ;;  %p1764_p12 = por %p1763_p4, %p1762_p2 }
  0xc9   : > { %p1766_p7 = por %p1765_p0, %p1764_p12 }
  0xcb   : > { %p1767_p9 = pnand %p1766_p7, %p1760_p10 }
  0xcd   : > { %1770 = shalt.err (!%p1767_p9)
}
  0xce   : > { %s1771_s10 = scalar_lea.vmem %s434_s1, 128  ;;  %s1874_s11 = smov [#allocation7]  }
  0xcf   : > { %p1772_p13 = scmp.ne.s32.totalorder %s434_s1, %s1771_s10  ;;  %s1776_s17 = sshll.u32 %s1874_s11, 4  ;;  %s1777_s17 = int_to_ptr.vmem [resolvable:$false] %s1776_s17 }
  0xd0   : > { %s1778_s15 = scalar_lea.vmem %s1777_s17, 256  ;;  %p1779_p6 = scmp.lt.s32.totalorder %s434_s1, %s1777_s17 }
  0xd1   : > { %p1774_p11 = pnand %p1772_p13, %p2429_p3  ;;  %p1780_p5 = scmp.lt.s32.totalorder %s1778_s15, %s1771_s10 }
  0xd3   : > { %p1775_p1 = pneg %p1774_p11  ;;  %p1781_p8 = por %p1780_p5, %p1779_p6 }
  0xd5   : > { %p1782_p2 = pnand %p1781_p8, %p1775_p1 }
  0xd7   : > { %1785 = shalt.err (!%p1782_p2)
}
  0xd8   : > { %p2431_p4 = scmp.ne.s32.totalorder %s2421_s12, 0  ;;  %p2432_p10 = scmp.ne.s32.totalorder %s2409_s24, 0 }
  0xd9   : > { %s2221_s25 = sand.u32 (!%p2432_p10), 1, %s1856_s18   ;;  %p2433_p3 = scmp.ne.s32.totalorder (!%p2432_p10), %s2416_s16, 0 }
  0xda   : > { %1493 = dma.hbm_to_vmem [thread:$0]  (!%p2431_p4), %s2197_s22, 128, %s434_s1, %s2094_s30  }
  0xdb   : > { %442 = sbr.rel (%p2432_p10) target bundleno = 1463 (0x5b7), region = 64  ;;  %s2224_s4 = sshll.u32 (!%p2432_p10), %s2221_s25, 3 }
  0xdc   : > { %s445_s8 = scalar_lea.sflag (!%p2432_p10), [#allocation3], %s2221_s25  ;;  %s448_s14 = scalar_lea.vmem (!%p2432_p10), [#allocation2], %s2224_s4 }
  0xe2   : > { %1831 = dma.done.wait (%p2433_p3), %s445_s8, 128  }
  0xe3   : > { %1833 = vsyncadd (%p2433_p3), %s445_s8, 4294967168  ;;  %s453_s24 = sand.u32 1, %s1959_s23   ;;  %s457_s12 = scalar_lea.vmem [#allocation5], %s2224_s4 }
  0xe4   : > { %s454_s30 = scalar_lea.sflag [#allocation6], %s453_s24 }
  0xe5   : > { %1835 = dma.done.wait (%p2433_p3), %s454_s30, 256  }
  0xe6   : > { %1837 = vsyncadd (%p2433_p3), %s454_s30, 4294967040  ;;  %s466_s21 = scalar_lea.vmem [#allocation7], %s2224_s4  ;;  %p2434_p8 = scmp.eq.s32.totalorder %s1959_s23, 0 }
  0xe8   : > { %1839 = dma.done.wait (%p2434_p8), [#allocation9], 2048   ;;  %p2435_p12 = pmov %p2434_p8 }
  0xe9   : > { %p2436_p0 = pmov %p2434_p8 }
  0xea   : > { %1841 = vsyncadd (%p2435_p12), [#allocation9], 4294965248 }
  0xeb   : > { %1843 = dma.done.wait (%p2436_p0), [#allocation12], 2048   ;;  %p2437_p7 = pmov %p2436_p0 }
  0xec   : > { %v1875_v0 = vmov 0.0   ;;  %vm1876_vm0 = vmmov 0   ;;  %v1548_v1 = vld [vmem:[#allocation10] sm:$0xff]   ;;  %v1549_v2 = vld [vmem:[#allocation10 + $0x8] sm:$0xff]   ;;  %v1551_v5 = vld [vmem:[#allocation10 + $0x10] sm:$0xff]   ;;  %s2438_s1 = sld [smem:[#allocation28_spill]] }
  0xed   : > { %1845 = vsyncadd (%p2437_p7), [#allocation12], 4294965248  ;;  %1375 = vmatprep.subr.bf16.mxu1 %v1875_v0  ;;  %1355 = vmatprep.subr.bf16.mxu0 %v1875_v0  ;;  %v1550_v3 = vld [vmem:[#allocation8] sm:$0xff]   ;;  %v1552_v4 = vld [vmem:[#allocation8 + $0x8] sm:$0xff]   ;;  %s2439_s26 = sld [smem:[#allocation30_spill]]  ;;  %vm930_vm1 = vcmask 1043456  }
  0xee   : > { %1391 = vmatprep.mubr.msk.bf16.mxu1 %vm1876_vm0, %v1875_v0  ;;  %1371 = vmatprep.mubr.msk.bf16.mxu0 %vm1876_vm0, %v1875_v0  ;;  %v1554_v6 = vld [vmem:[#allocation8 + $0x10] sm:$0xff]   ;;  %v1553_v7 = vld [vmem:[#allocation10 + $0x18] sm:$0xff]   ;;  %v1555_v9 = vld [vmem:[#allocation10 + $0x20] sm:$0xff]   ;;  %vm913_vm2 = vcmask 64512   ;;  %s2440_s13 = sld [smem:[#allocation31_spill]]  ;;  %s2441_s10 = sld [smem:[#allocation24_spill]] }
  0xef   : > { %1376 = vmatpush3.bf16.msra.mxu1 %v1548_v1  ;;  %1356 = vmatpush3.bf16.msra.mxu0 %v1550_v3  ;;  %v1556_v8 = vld [vmem:[#allocation8 + $0x18] sm:$0xff]   ;;  %v1558_v10 = vld [vmem:[#allocation8 + $0x20] sm:$0xff]   ;;  %v1557_v11 = vld [vmem:[#allocation10 + $0x28] sm:$0xff]   ;;  %s1312_s11 = sshll.u32 %s1959_s23, 7  ;;  %s530_s17 = scalar_lea.vmem [#allocation14], %s2224_s4 }
  0xf0   : > { %1377 = vmatprep.subr.bf16.mxu1 %v1875_v0  ;;  %1357 = vmatprep.subr.bf16.mxu0 %v1875_v0  ;;  %v1560_v12 = vld [vmem:[#allocation8 + $0x28] sm:$0xff]   ;;  %v1559_v13 = vld [vmem:[#allocation10 + $0x30] sm:$0xff]   ;;  %v1561_v14 = vld [vmem:[#allocation10 + $0x38] sm:$0xff]   ;;  %s1101_s15 = sshll.u32 %s530_s17, 4  ;;  %s2442_s24 = sld [smem:[#allocation32_spill]]  ;;  %s2321_s15 = int_to_ptr.vmem [resolvable:$true] %s1101_s15 }
  0xf1   : > { %v1562_v15 = vld [vmem:[#allocation8 + $0x30] sm:$0xff]   ;;  %v645_v16 = vld [vmem:[%s457_s12] sm:$0xff]  ;;  %v1563_v17 = vld [vmem:[#allocation8 + $0x38] sm:$0xff]   ;;  %s1088_s12 = scalar_lea.sflag [#allocation4], %s2221_s25  ;;  %s1786_s23 = scalar_lea.vmem %s2321_s15, 128 }
  0xf2   : > { %v532_v18 = vld [vmem:[%s448_s14] sm:$0xff]  ;;  %v646_v19 = vpack.c.bf16 %v645_v16, %v645_v16  ;;  %v1564_v21 = vld [vmem:[#allocation11] sm:$0xff]   ;;  %v1565_v22 = vld [vmem:[#allocation11 + $0x8] sm:$0xff]   ;;  %p1787_p9 = scmp.ne.s32.totalorder %s2321_s15, %s1786_s23  ;;  %s1877_s4 = smov [#allocation14]  }
  0xf3   : > { %1378 = vmatpush3.bf16.msra.mxu1 %v1549_v2  ;;  %1358 = vmatpush3.bf16.msra.mxu0 %v1552_v4  ;;  %v533_v20 = vpack.c.bf16 %v532_v18, %v532_v18  ;;  %v1566_v23 = vld [vmem:[#allocation11 + $0x10] sm:$0xff]   ;;  %v1567_v24 = vld [vmem:[#allocation11 + $0x18] sm:$0xff]   ;;  %v1568_v25 = vld [vmem:[#allocation11 + $0x20] sm:$0xff]  }
  0xf4   : > { %1379 = vmatprep.subr.bf16.mxu1 %v1875_v0  ;;  %1359 = vmatprep.subr.bf16.mxu0 %v1875_v0  ;;  %v1569_v26 = vld [vmem:[#allocation11 + $0x28] sm:$0xff]   ;;  %v1570_v27 = vld [vmem:[#allocation11 + $0x30] sm:$0xff]   ;;  %v1571_v28 = vld [vmem:[#allocation11 + $0x38] sm:$0xff]   ;;  %p2443_p13 = scmp.ne.s32.totalorder %s2441_s10, 0 }
  0xf5   : > { %v758_v29 = vld [vmem:[%s466_s21] sm:$0xff]  ;;  %v1572_v3 = vld [vmem:[#allocation13] sm:$0xff]   ;;  %s1790_s21 = sshll.u32 %s1877_s4, 4  ;;  %s1791_s21 = int_to_ptr.vmem [resolvable:$false] %s1790_s21 }
  0xf6   : > { %v759_v30 = vpack.c.bf16 %v758_v29, %v758_v29  ;;  %v1283_v31 = vld [vmem:[%s2369_s6] ss:$0 sm:$0xff]  ;;  %s2319_s30 = scalar_lea.hbm %s2442_s24, %s1312_s11  ;;  %p1788_p11 = pnand %p1787_p9, %p2443_p13 }
  0xf7   : > { %1380 = vmatpush3.bf16.msra.mxu1 %v1551_v5  ;;  %1360 = vmatpush3.bf16.msra.mxu0 %v1554_v6  ;;  %v1274_v35 = vld [vmem:[%s2438_s1] ss:$0 sm:$0xff]  ;;  %v1573_v5 = vld [vmem:[#allocation13 + $0x8] sm:$0xff]   ;;  %s1792_s16 = scalar_lea.vmem %s1791_s21, 256  ;;  %p1793_p6 = scmp.lt.s32.totalorder %s2321_s15, %s1791_s21 }
  0xf8   : > { %1381 = vmatprep.subr.bf16.mxu1 %v1875_v0  ;;  %1361 = vmatprep.subr.bf16.mxu0 %v1875_v0  ;;  %v1292_v45 = vld [vmem:[%s2439_s26] ss:$0 sm:$0xff]  ;;  %p1789_p1 = pneg %p1788_p11  ;;  %p1794_p5 = scmp.lt.s32.totalorder %s1792_s16, %s1786_s23 }
  0xf9   : > { %v1574_v6 = vld [vmem:[#allocation13 + $0x10] sm:$0xff]  }
  0xfa   : > { %p1795_p2 = por %p1794_p5, %p1793_p6 }
  0xfb   : > { %1382 = vmatpush3.bf16.msra.mxu1 %v1553_v7  ;;  %1362 = vmatpush3.bf16.msra.mxu0 %v1556_v8  ;;  %v1575_v7 = vld [vmem:[#allocation13 + $0x18] sm:$0xff]   ;;  %v1576_v8 = vld [vmem:[#allocation13 + $0x20] sm:$0xff]  }
  0xfc   : > { %1383 = vmatprep.subr.bf16.mxu1 %v1875_v0  ;;  %1363 = vmatprep.subr.bf16.mxu0 %v1875_v0  ;;  %p1796_p4 = pnand %p1795_p2, %p1789_p1 }
  0xff   : > { %1384 = vmatpush3.bf16.msra.mxu1 %v1555_v9  ;;  %1364 = vmatpush3.bf16.msra.mxu0 %v1558_v10  ;;  %v1577_v9 = vld [vmem:[#allocation13 + $0x28] sm:$0xff]   ;;  %v1578_v10 = vld [vmem:[#allocation13 + $0x30] sm:$0xff]  }
 0x100   : > { %1385 = vmatprep.subr.bf16.mxu1 %v1875_v0  ;;  %1365 = vmatprep.subr.bf16.mxu0 %v1875_v0 }
 0x103   : > { %1386 = vmatpush3.bf16.msra.mxu1 %v1557_v11  ;;  %1366 = vmatpush3.bf16.msra.mxu0 %v1560_v12  ;;  %v1579_v11 = vld [vmem:[#allocation13 + $0x38] sm:$0xff]  }
 0x104   : > { %1387 = vmatprep.subr.bf16.mxu1 %v1875_v0  ;;  %1367 = vmatprep.subr.bf16.mxu0 %v1875_v0 }
 0x107   : > { %1388 = vmatpush3.bf16.msra.mxu1 %v1559_v13  ;;  %1368 = vmatpush3.bf16.msra.mxu0 %v1562_v15 }
 0x108   : > { %1389 = vmatprep.subr.bf16.mxu1 %v1875_v0  ;;  %1369 = vmatprep.subr.bf16.mxu0 %v1875_v0 }
 0x10b   : > { %1390 = vmatpush3.bf16.msra.mxu1 %v1561_v14  ;;  %1370 = vmatpush3.bf16.msra.mxu0 %v1563_v17  ;;  %v1302_v17 = vld [vmem:[%s2440_s13] ss:$0 sm:$0xff] }
 0x10c   : > { %1421 = vmatprep.subr.bf16.mxu1 %v1875_v0  ;;  %1395 = vmatprep.subr.bf16.mxu0 %v1875_v0 }
 0x10e   : > { %1392 = vmatmul.mubr.bf16.vlgmr.msra.gmra.mrb[0].mxu1 %v646_v19  ;;  %1372 = vmatmul.mubr.bf16.vlgmr.msra.gmra.mrb[0].mxu0 %v533_v20 }
 0x10f   : > { %1423 = vmatprep.mubr.msk.bf16.mxu1 %vm1876_vm0, %v1875_v0  ;;  %1396 = vmatpush3.bf16.msra.mxu0 %v1564_v21 }
 0x110   : > { %1411 = vmatprep.mubr.msk.bf16.mxu0 %vm1876_vm0, %v1875_v0  ;;  %1397 = vmatprep.subr.bf16.mxu0 %v1875_v0 }
 0x113   : > { %1398 = vmatpush3.bf16.msra.mxu0 %v1565_v22 }
 0x114   : > { %1399 = vmatprep.subr.bf16.mxu0 %v1875_v0 }
 0x117   : > { %1400 = vmatpush3.bf16.msra.mxu0 %v1566_v23 }
 0x118   : > { %1401 = vmatprep.subr.bf16.mxu0 %v1875_v0 }
 0x11b   : > { %1402 = vmatpush3.bf16.msra.mxu0 %v1567_v24 }
 0x11c   : > { %1403 = vmatprep.subr.bf16.mxu0 %v1875_v0 }
 0x11f   : > { %1404 = vmatpush3.bf16.msra.mxu0 %v1568_v25 }
 0x120   : > { %1405 = vmatprep.subr.bf16.mxu0 %v1875_v0 }
 0x123   : > { %1406 = vmatpush3.bf16.msra.mxu0 %v1569_v26 }
 0x124   : > { %1407 = vmatprep.subr.bf16.mxu0 %v1875_v0 }
 0x127   : > { %1408 = vmatpush3.bf16.msra.mxu0 %v1570_v27 }
 0x128   : > { %1409 = vmatprep.subr.bf16.mxu0 %v1875_v0 }
 0x12b   : > { %1410 = vmatpush3.bf16.msra.mxu0 %v1571_v28 }
 0x12c   : > { %1415 = vmatprep.subr.bf16.mxu0 %v1875_v0 }
 0x12e   : > { %1412 = vmatmul.mubr.bf16.vlgmr.msra.gmra.mrb[4].mxu0 %v759_v30 }
 0x12f   : > { %1417 = vmatprep.mubr.msk.bf16.mxu0 %vm1876_vm0, %v1875_v0 }
 0x1e1   : > { %v752_v32 = vpop.f32.mrb[0].mxu1  ;;  %v639_v37 = vpop.f32.mrb[0].mxu0 }
 0x1e2   : > { %v753_v33 = vadd.f32 %v1283_v31, %v752_v32  ;;  %v1393_v34 = vpop.f32.mrb[1].mxu1  ;;  %v1373_v40 = vpop.f32.mrb[1].mxu0  ;;  %v640_v41 = vadd.f32 %v1274_v35, %v639_v37 }
 0x1e3   : > { %v755_v36 = vpop.f32.mrb[2].mxu1  ;;  %v642_v42 = vpop.f32.mrb[2].mxu0 }
 0x1e4   : > { %v872_v38 = vpack.c.bf16 %v753_v33, %v753_v33  ;;  %v1394_v39 = vpop.f32.mrb[3].mxu1  ;;  %v1374_v43 = vpop.f32.mrb[3].mxu0  ;;  %v871_v44 = vpack.c.bf16 %v640_v41, %v640_v41 }
 0x1e6   : > { %1416 = vmatpush3.bf16.xpose.msra.mxu0 %v872_v38 }
 0x1ed   : > { %1418 = vmatmul.mubr.bf16.vlgmr.msra.gmra.mrb[8].mxu0 %v871_v44 }
 0x201   : > { %v865_v46 = vpop.f32.mrb[4].mxu0 }
 0x202   : > { %v866_v47 = vadd.f32 %v1292_v45, %v865_v46  ;;  %v1413_v48 = vpop.f32.mrb[5].mxu0 }
 0x203   : > { %v868_v49 = vpop.f32.mrb[6].mxu0 }
 0x204   : > { %v926_v50 = vpack.c.bf16 %v866_v47, %v866_v47  ;;  %v1414_v51 = vpop.f32.mrb[7].mxu0 }
 0x206   : > { %v932_v52 = vsel %vm930_vm1, %v926_v50, 0 }
 0x207   : > { %1422 = vmatpush3.bf16.msra.mxu1 %v932_v52 }
 0x208   : > { %1427 = vmatprep.subr.bf16.mxu1 %v1875_v0 }
 0x2c0   : > { %v907_v53 = vpop.f32.mrb[8].mxu0 }
 0x2c1   : > { %v1419_v54 = vpop.f32.mrb[9].mxu0  ;;  %v914_v55 = vsel %vm913_vm2, %v907_v53, -inf }
 0x2c2   : > { %915 = vmax.xlane.f32.xlu0 %v914_v55  ;;  %v910_v56 = vpop.f32.mrb[10].mxu0 }
 0x2c3   : > { %v1420_v57 = vpop.f32.mrb[11].mxu0 }
 0x34f   : > { %v916_v58 = vpop.xlane.xlu0 %915 }
 0x350   : > { %v917_v59 = vsub.f32 %v907_v53, %v916_v58 }
 0x352   : > { %v918_v60 = vmul.f32 1.442695, %v917_v59 }
 0x354   : > { %1580 = vpow2.f32 %v918_v60 }
 0x35e   : > { %v1581_v61 = vpop.eup %1580 }
 0x35f   : > { %v920_v62 = vsel %vm913_vm2, %v1581_v61, 0.0 }
 0x360   : > { %921 = vadd.xlane.f32.xlu0 %v920_v62 }
 0x3ed   : > { %v922_v63 = vpop.xlane.xlu0 %921 }
 0x3ee   : > { %1582 = vrcp.f32 %v922_v63 }
 0x3f8   : > { %v1583_v1 = vpop.eup %1582 }
 0x3f9   : > { %v924_v2 = vmul.f32 %v1583_v1, %v1581_v61 }
 0x3fb   : > { %v925_v4 = vpack.c.bf16 %v924_v2, %v924_v2 }
 0x3fd   : > { %1424 = vmatmul.mubr.msk.bf16.vlgmr.msra.gmra.mrb[4].mxu1 %vm913_vm2, %v925_v4 }
 0x3fe   : > { %1428 = vmatpush3.bf16.msra.mxu1 %v1572_v3  ;;  %1443 = vmatprep.mubr.msk.bf16.mxu1 %vm1876_vm0, %v1875_v0 }
 0x3ff   : > { %1429 = vmatprep.subr.bf16.mxu1 %v1875_v0 }
 0x402   : > { %1430 = vmatpush3.bf16.msra.mxu1 %v1573_v5 }
 0x403   : > { %1431 = vmatprep.subr.bf16.mxu1 %v1875_v0 }
 0x406   : > { %1432 = vmatpush3.bf16.msra.mxu1 %v1574_v6 }
 0x407   : > { %1433 = vmatprep.subr.bf16.mxu1 %v1875_v0 }
 0x40a   : > { %1434 = vmatpush3.bf16.msra.mxu1 %v1575_v7 }
 0x40b   : > { %1435 = vmatprep.subr.bf16.mxu1 %v1875_v0 }
 0x40e   : > { %1436 = vmatpush3.bf16.msra.mxu1 %v1576_v8 }
 0x40f   : > { %1437 = vmatprep.subr.bf16.mxu1 %v1875_v0 }
 0x412   : > { %1438 = vmatpush3.bf16.msra.mxu1 %v1577_v9 }
 0x413   : > { %1439 = vmatprep.subr.bf16.mxu1 %v1875_v0 }
 0x416   : > { %1440 = vmatpush3.bf16.msra.mxu1 %v1578_v10 }
 0x417   : > { %1441 = vmatprep.subr.bf16.mxu1 %v1875_v0 }
 0x41a   : > { %1442 = vmatpush3.bf16.msra.mxu1 %v1579_v11 }
 0x4d0   : > { %v968_v12 = vpop.f32.mrb[4].mxu1 }
 0x4d1   : > { %v974_v13 = vpack.c.bf16 %v968_v12, %v968_v12  ;;  %v1425_v14 = vpop.f32.mrb[5].mxu1 }
 0x4d2   : > { %v971_v15 = vpop.f32.mrb[6].mxu1 }
 0x4d3   : > { %v1426_v16 = vpop.f32.mrb[7].mxu1  ;;  %1444 = vmatmul.mubr.bf16.vlgmr.msra.gmra.mrb[8].mxu1 %v974_v13 }
 0x5a6   : > { %v1080_v18 = vpop.f32.mrb[8].mxu1 }
 0x5a7   : > { %v1081_v19 = vadd.f32 %v1302_v17, %v1080_v18  ;;  %v1445_v0 = vpop.f32.mrb[9].mxu1 }
 0x5a8   : > { %v1083_v20 = vpop.f32.mrb[10].mxu1 }
 0x5a9   : > { %1086 = vst [vmem:[%s530_s17] sm:$0xff] %v1081_v19  ;;  %v1446_v21 = vpop.f32.mrb[11].mxu1 }
 0x5aa   : > { %1799 = shalt.err (!%p1796_p4)
}
 0x5ab   : > { %s1800_s25 = scalar_lea.hbm %s2319_s30, 128  ;;  %s1804_s29 = scalar_lea.hbm %s2442_s24, 256 }
 0x5ac   : > { %p1801_p10 = scmp.ne.s32.totalorder %s2319_s30, %s1800_s25  ;;  %p1805_p12 = scmp.lt.u32.totalorder %s2319_s30, %s2442_s24 }
 0x5ad   : > { %p1806_p0 = scmp.lt.u32.totalorder %s1804_s29, %s1800_s25  ;;  %p1808_p9 = scmp.lt.u32.totalorder %s1800_s25, %s2319_s30 }
 0x5ae   : > { %p1802_p3 = pnand %p1801_p10, %p2443_p13 }
 0x5af   : > { %p1807_p7 = por %p1806_p0, %p1805_p12 }
 0x5b0   : > { %p1803_p8 = pneg %p1802_p3 }
 0x5b1   : > { %p1809_p11 = por %p1808_p9, %p1807_p7 }
 0x5b3   : > { %p1810_p1 = pnand %p1809_p11, %p1803_p8 }
 0x5b5   : > { %1813 = shalt.err (!%p1810_p1)
}
 0x5b6   : > { %1469 = dma.vmem_to_hbm [thread:$0]  (%p2443_p13), %s2321_s15, 128, %s2319_s30, %s1088_s12  }
 0x5b7 PF: > { %s2444_s7 = sld [smem:[#allocation20_spill]]  ;;  %s2445_s26 = sld [smem:[#allocation25_spill]] }
 0x5b8   : > { %s2446_s28 = sld [smem:[#allocation21_spill]] }
 0x5bd   : > { %s1113_s20 = sand.u32 1, %s2444_s7   ;;  %p2447_p6 = scmp.ne.s32.totalorder %s2445_s26, 0 }
 0x5be   : > { %p2448_p5 = scmp.ge.s32.totalorder %s2446_s28, 2  ;;  %s1114_s13 = scalar_lea.sflag [#allocation4], %s1113_s20 }
 0x5c0   : > { %p1495_p2 = pnand %p2448_p5, %p2447_p6 }
 0x5c2   : > { %1847 = dma.done.wait (!%p1495_p2), %s1114_s13, 128  }
 0x5c3   : > { %1849 = vsyncadd (!%p1495_p2), %s1114_s13, 4294967168  ;;  %s2449_s20 = sld [smem:[#allocation22_spill]]  ;;  %s2450_s11 = sld [smem:[#allocation23_spill]] }
 0x5c4   : > { %s2451_s17 = smov %s1856_s18  ;;  %s2452_s18 = smov %s1860_s19 }
 0x5c9   : > { %p29_p4 = scmp.ge.s32.totalorder %s2449_s20, 4   ;;  %s2453_s19 = smov %s2450_s11 }
 0x5cb   :  { %31 = sbr.rel (!%p29_p4) target bundleno = 17 (0x11), region = 149 }
 0x5d2   :  { %1119 = vsyncpa [#allocation3], 1 }
 0x5d3   :  { %1121 = vsyncpa [#allocation3 + $0x1], 1 }
 0x5d4   :  { %1122 = vsyncpa [#allocation6], 1 }
 0x5d5   :  { %1124 = vsyncpa [#allocation6 + $0x1], 1 }
 0x5d6   :  { %1125 = vsyncpa [#allocation9], 1 }
 0x5d7   :  { %1126 = vsyncpa [#allocation12], 1 }
 0x5d8   :  { %1127 = vsyncpa [#allocation4], 1 }
 0x5d9   :  { %1129 = vsyncpa [#allocation4 + $0x1], 1 }

// kernel: tpu_custom_call.1
= control target key start
LH: loop header
LB: loop body
LE: loop exit
PB: predicated region body
PF: predicated region fallthrough
CT: control target
= control target key end

     0   :  { %s2363_s0 = inlined_call_operand.hbm [shape: f32[16,128], index: 0, kind: input, shape index: {}]   ;;  %s2364_s1 = inlined_call_operand.hbm [shape: f32[16,128], index: 1, kind: input, shape index: {}]   ;;  %s2365_s2 = inlined_call_operand.hbm [shape: f32[16,128], index: 2, kind: input, shape index: {}]   ;;  %s2366_s3 = inlined_call_operand.hbm [shape: bf16[128,128], index: 3, kind: input, shape index: {}]   ;;  %s2367_s4 = inlined_call_operand.vmem [shape: f32[1,128], index: 4, kind: input, shape index: {}]   ;;  %s2368_s5 = inlined_call_operand.hbm [shape: bf16[128,128], index: 5, kind: input, shape index: {}]   ;;  %s2369_s6 = inlined_call_operand.vmem [shape: f32[1,128], index: 6, kind: input, shape index: {}]   ;;  %s2370_s7 = inlined_call_operand.hbm [shape: bf16[128,128], index: 7, kind: input, shape index: {}]   ;;  %s2371_s8 = inlined_call_operand.vmem [shape: f32[1,128], index: 8, kind: input, shape index: {}]   ;;  %s2372_s9 = inlined_call_operand.hbm [shape: bf16[128,128], index: 9, kind: input, shape index: {}]   ;;  %s2373_s10 = inlined_call_operand.vmem [shape: f32[1,128], index: 10, kind: input, shape index: {}]   ;;  %s2374_s11 = inlined_call_operand.hbm [shape: f32[16,128], index: 11, kind: output, shape index: {}]  }
   0x1   :  { %2400 = sst [smem:[#allocation26_spill]] %s2364_s1 }
   0x2   :  { %2401 = sst [smem:[#allocation27_spill]] %s2366_s3 }
   0x3   :  { %2402 = sst [smem:[#allocation28_spill]] %s2367_s4 }
   0x4   :  { %2403 = sst [smem:[#allocation29_spill]] %s2370_s7 }
   0x5   :  { %2404 = sst [smem:[#allocation30_spill]] %s2371_s8 }
   0x6   :  { %2405 = sst [smem:[#allocation31_spill]] %s2373_s10 }
   0x7   :  { %2406 = sst [smem:[#allocation32_spill]] %s2374_s11 }
   0x8   :  { %16 = vsyncpa [#allocation3], 0 }
   0x9   :  { %18 = vsyncpa [#allocation3 + $0x1], 0 }
   0xa   :  { %19 = vsyncpa [#allocation6], 0 }
   0xb   :  { %21 = vsyncpa [#allocation6 + $0x1], 0 }
   0xc   :  { %22 = vsyncpa [#allocation9], 0 }
   0xd   :  { %23 = vsyncpa [#allocation12], 0 }
   0xe   :  { %24 = vsyncpa [#allocation4], 0 }
   0xf   :  { %26 = vsyncpa [#allocation4 + $0x1], 0  ;;  %s1938_s17 = smov 0   ;;  %s1940_s18 = smov 0  }
  0x10   :  { %s1942_s19 = smov 0   ;;  %s1944_s20 = smov 0  }
  0x11 LB: > { %2407 = sst [smem:[#allocation20_spill]] %s1852_s17  ;;  %s1866_s21 = smov [#allocation8]   ;;  %s1864_s20 = sphi %s1944_s20, %s2449_s20   ;;  %s1860_s19 = sphi %s1942_s19, %s2453_s19   ;;  %s1856_s18 = sphi %s1940_s18, %s2452_s18   ;;  %s1852_s17 = sphi %s1938_s17, %s2451_s17  }
  0x12   : > { %2408 = sst [smem:[#allocation21_spill]] %s1864_s20  ;;  %s321_s22 = sshll.u32 %s1866_s21, 4  ;;  %s1964_s22 = int_to_ptr.vmem [resolvable:$true] %s321_s22 }
  0x13   : > { %s1959_s23 = sadd.s32 4294967295, %s1864_s20   ;;  %p1253_p0 = scmp.ge.s32.totalorder %s1864_s20, 1 }
  0x14   : > { %p2387_p1 = scmp.eq.s32.totalorder %s1959_s23, 0  ;;  %p309_p2 = scmp.lt.s32.totalorder %s1864_s20, 3 }
  0x15   : > { %s1867_s25 = smov [#allocation11]   ;;  %s2411_s3 = sld [smem:[#allocation27_spill]] }
  0x16   : > { %p1966_p3 = pnand %p1253_p0, %p309_p2  ;;  %s353_s26 = sshll.u32 %s1867_s25, 4  ;;  %s1979_s26 = int_to_ptr.vmem [resolvable:$true] %s353_s26 }
  0x18   : > { %s2409_s24 = scalar_select %p1966_p3, 1, 0 }
  0x19   : > { %p1471_p5 = pneg %p1966_p3 }
  0x1b   : > { %p1975_p6 = pnand %p1471_p5, %p2387_p1  ;;  %s1584_s30 = scalar_lea.hbm %s2411_s3, 1024 }
  0x1c   : > { %p1585_p7 = scmp.ne.s32.totalorder %s2411_s3, %s1584_s30  ;;  %p1591_p11 = scmp.lt.u32.totalorder %s1584_s30, %s2411_s3 }
  0x1d   : > { %s2410_s27 = scalar_select %p1975_p6, 1, 0 }
  0x1e   : > { %p1989_p8 = pneg %p1975_p6 }
  0x20   : > { %s2412_s14 = scalar_select %p1989_p8, 1, 0 }
  0x21   : > { %p1587_p9 = pnand %p1989_p8, %p1585_p7 }
  0x23   : > { %p1588_p10 = pneg %p1587_p9 }
  0x25   : > { %p1593_p12 = pnand %p1591_p11, %p1588_p10 }
  0x27   : > { %1596 = shalt.err (!%p1593_p12)
}
  0x28   : > { %s1597_s21 = scalar_lea.vmem %s1964_s22, 1024  ;;  %p1605_p5 = scmp.lt.s32.totalorder %s1964_s22, %s1964_s22 }
  0x29   : > { %p1598_p13 = scmp.ne.s32.totalorder %s1964_s22, %s1597_s21  ;;  %p1606_p4 = scmp.lt.s32.totalorder %s1597_s21, %s1597_s21 }
  0x2b   : > { %p1600_p0 = pnand %p1598_p13, %p1989_p8  ;;  %p1607_p7 = por %p1606_p4, %p1605_p5 }
  0x2d   : > { %p1601_p2 = pneg %p1600_p0 }
  0x2f   : > { %p1608_p9 = pnand %p1607_p7, %p1601_p2 }
  0x31   : > { %1611 = shalt.err (!%p1608_p9)
}
  0x32   : > { %s2377_s25 = smov 64   ;;  %s2379_s28 = smov 4  }
  0x33   : > { %1474 = dma.hbm_to_vmem [thread:$0]  (!%p1975_p6), %s2411_s3, 1024, %s1964_s22, [#allocation9], %s2377_s25, %s2377_s25, %s2379_s28  }
  0x34   : > { %s2413_s7 = sld [smem:[#allocation29_spill]] }
  0x3a   : > { %s1612_s15 = scalar_lea.hbm %s2413_s7, 1024 }
  0x3b   : > { %p1613_p4 = scmp.ne.s32.totalorder %s2413_s7, %s1612_s15  ;;  %p1619_p12 = scmp.lt.u32.totalorder %s1612_s15, %s2413_s7 }
  0x3d   : > { %p1615_p10 = pnand %p1613_p4, %p1989_p8 }
  0x3f   : > { %p1616_p11 = pneg %p1615_p10 }
  0x41   : > { %p1621_p13 = pnand %p1619_p12, %p1616_p11 }
  0x43   : > { %1624 = shalt.err (!%p1621_p13)
}
  0x44   : > { %s1625_s22 = scalar_lea.vmem %s1979_s26, 1024  ;;  %p1633_p7 = scmp.lt.s32.totalorder %s1979_s26, %s1979_s26 }
  0x45   : > { %p1626_p0 = scmp.ne.s32.totalorder %s1979_s26, %s1625_s22  ;;  %p1634_p9 = scmp.lt.s32.totalorder %s1625_s22, %s1625_s22 }
  0x47   : > { %p1628_p2 = pnand %p1626_p0, %p1989_p8  ;;  %p1635_p4 = por %p1634_p9, %p1633_p7 }
  0x49   : > { %p1629_p5 = pneg %p1628_p2 }
  0x4b   : > { %p1636_p10 = pnand %p1635_p4, %p1629_p5 }
  0x4d   : > { %1639 = shalt.err (!%p1636_p10)
}
  0x4e   : > { %1480 = dma.hbm_to_vmem [thread:$0]  (!%p1975_p6), %s2413_s7, 1024, %s1979_s26, [#allocation12], %s2377_s25, %s2377_s25, %s2379_s28  }
  0x4f   : > { %s1252_s29 = sadd.s32 4294967294, %s1864_s20   ;;  %s2041_s30 = sadd.s32 1, %s1864_s20  }
  0x50   : > { %2414 = sst [smem:[#allocation22_spill]] %s2041_s30  ;;  %s36_s12 = ssub.s32 %s1864_s20, %s2041_s30 }
  0x51   : > { %s39_s13 = sadd.s32 1, %s1860_s19  ;;  %p37_p11 = scmp.eq.s32.totalorder %s36_s12, 0 }
  0x52   : > { %p46_p12 = scmp.ne.s32.totalorder %s1860_s19, %s1856_s18  ;;  %p47_p13 = scmp.eq.s32.totalorder %s1864_s20, 0 }
  0x53   : > { %p52_p0 = scmp.ne.s32.totalorder %s1856_s18, %s1852_s17  ;;  %p296_p7 = scmp.eq.s32.totalorder %s1959_s23, 1 }
  0x54   : > { %s2052_s15 = scalar_select %p37_p11, %s1860_s19, %s39_s13  }
  0x55   : > { %p48_p2 = por %p47_p13, %p46_p12  ;;  %p2056_p5 = por %p2387_p1, %p52_p0 }
  0x56   : > { %2415 = sst [smem:[#allocation23_spill]] %s2052_s15  ;;  %p302_p9 = scmp.eq.s32.totalorder %s1252_s29, 1 }
  0x57   : > { %s2416_s16 = scalar_select %p2056_p5, 1, 0 }
  0x58   : > { %p1502_p4 = scmp.lt.s32.totalorder %s1864_s20, 2  ;;  %s2381_s26 = sand.u32 1, %s1860_s19  }
  0x59   : > { %p2063_p10 = por %p296_p7, %p46_p12  ;;  %p2067_p3 = por %p302_p9, %p52_p0 }
  0x5a   : > { %s2073_s10 = sshll.u32 %s2381_s26, 3  ;;  %s2076_s11 = sshll.u32 %s1864_s20, 7 }
  0x5b   : > { %s2417_s21 = scalar_select %p2063_p10, 1, 0 }
  0x5c   : > { %s2419_s22 = scalar_select %p2067_p3, 1, 0 }
  0x5d   : > { %2418 = sst [smem:[#allocation24_spill]] %s2417_s21  ;;  %p2078_p11 = pnand %p1502_p4, %p48_p2 }
  0x5e   : > { %2420 = sst [smem:[#allocation25_spill]] %s2419_s22  ;;  %s404_s29 = sand.u32 1, %s1864_s20  }
  0x5f   : > { %s2421_s12 = scalar_select %p2078_p11, 1, 0 }
  0x60   : > { %s2422_s1 = sld [smem:[#allocation26_spill]]  ;;  %s408_s26 = scalar_lea.vmem [#allocation5], %s2073_s10 }
  0x61   : > { %s415_s3 = sshll.u32 %s408_s26, 4  ;;  %s1870_s7 = smov [#allocation10]   ;;  %s2090_s3 = int_to_ptr.vmem [resolvable:$true] %s415_s3 }
  0x62   : > { %s2092_s15 = sshll.u32 %s1870_s7, 4  ;;  %s2094_s30 = scalar_lea.sflag [#allocation6], %s404_s29  ;;  %s338_s15 = int_to_ptr.vmem [resolvable:$true] %s2092_s15 }
  0x63   : > { %p2100_p13 = pneg %p2078_p11 }
  0x65   : > { %s2423_s25 = scalar_select %p2100_p13, 1, 0 }
  0x66   : > { %s2087_s28 = scalar_lea.hbm %s2422_s1, %s2076_s11  ;;  %s1645_s20 = scalar_lea.hbm %s2422_s1, 256 }
  0x67   : > { %s1640_s22 = scalar_lea.hbm %s2087_s28, 128  ;;  %p1646_p7 = scmp.lt.u32.totalorder %s2087_s28, %s2422_s1 }
  0x68   : > { %p1641_p12 = scmp.ne.s32.totalorder %s2087_s28, %s1640_s22  ;;  %p1647_p9 = scmp.lt.u32.totalorder %s1645_s20, %s1640_s22 }
  0x69   : > { %p1649_p1 = scmp.lt.u32.totalorder %s1640_s22, %s2087_s28 }
  0x6a   : > { %p1643_p0 = pnand %p2100_p13, %p1641_p12  ;;  %p1648_p4 = por %p1647_p9, %p1646_p7 }
  0x6c   : > { %p1644_p2 = pneg %p1643_p0  ;;  %p1650_p3 = por %p1649_p1, %p1648_p4 }
  0x6e   : > { %p1651_p10 = pnand %p1650_p3, %p1644_p2 }
  0x70   : > { %1654 = shalt.err (!%p1651_p10)
}
  0x71   : > { %s1655_s29 = scalar_lea.vmem %s2090_s3, 128  ;;  %s1871_s13 = smov [#allocation5]  }
  0x72   : > { %p1656_p12 = scmp.ne.s32.totalorder %s2090_s3, %s1655_s29  ;;  %s1660_s26 = sshll.u32 %s1871_s13, 4  ;;  %s1661_s26 = int_to_ptr.vmem [resolvable:$false] %s1660_s26 }
  0x73   : > { %s1662_s17 = scalar_lea.vmem %s1661_s26, 256  ;;  %p1663_p6 = scmp.lt.s32.totalorder %s2090_s3, %s1661_s26 }
  0x74   : > { %p1658_p0 = pnand %p1656_p12, %p2100_p13  ;;  %p1664_p8 = scmp.lt.s32.totalorder %s1662_s17, %s1655_s29 }
  0x76   : > { %p1659_p5 = pneg %p1658_p0  ;;  %p1665_p7 = por %p1664_p8, %p1663_p6 }
  0x78   : > { %p1666_p9 = pnand %p1665_p7, %p1659_p5 }
  0x7a   : > { %1669 = shalt.err (!%p1666_p9)
}
  0x7b   : > { %1490 = dma.hbm_to_vmem [thread:$0]  (!%p2078_p11), %s2087_s28, 128, %s2090_s3, %s2094_s30  }
  0x7c   : > { %s1670_s7 = scalar_lea.hbm %s2368_s5, 1024  ;;  %p2424_p3 = scmp.ne.s32.totalorder %s2412_s14, 0 }
  0x7d   : > { %p1671_p1 = scmp.ne.s32.totalorder %s2368_s5, %s1670_s7  ;;  %p1677_p5 = scmp.lt.u32.totalorder %s1670_s7, %s2368_s5 }
  0x7f   : > { %p1673_p6 = pnand %p1671_p1, %p2424_p3 }
  0x81   : > { %p1674_p8 = pneg %p1673_p6 }
  0x83   : > { %p1679_p10 = pnand %p1677_p5, %p1674_p8 }
  0x85   : > { %1682 = shalt.err (!%p1679_p10)
}
  0x86   : > { %s1683_s17 = scalar_lea.vmem %s338_s15, 1024  ;;  %p1691_p0 = scmp.lt.s32.totalorder %s338_s15, %s338_s15 }
  0x87   : > { %p1684_p2 = scmp.ne.s32.totalorder %s338_s15, %s1683_s17  ;;  %p1692_p7 = scmp.lt.s32.totalorder %s1683_s17, %s1683_s17 }
  0x89   : > { %p1686_p4 = pnand %p1684_p2, %p2424_p3  ;;  %p1693_p9 = por %p1692_p7, %p1691_p0 }
  0x8b   : > { %p1687_p12 = pneg %p1686_p4 }
  0x8d   : > { %p1694_p11 = pnand %p1693_p9, %p1687_p12 }
  0x8f   : > { %1697 = shalt.err (!%p1694_p11)
}
  0x90   : > { %p2425_p1 = scmp.ne.s32.totalorder %s2410_s27, 0  ;;  %s2426_s1 = smov 4  }
  0x91   : > { %s2427_s3 = smov 64   ;;  %s1872_s22 = smov [#allocation13]  }
  0x92   : > { %1477 = dma.hbm_to_vmem [thread:$0]  (!%p2425_p1), %s2368_s5, 1024, %s338_s15, [#allocation9], %s2427_s3, %s2427_s3, %s2426_s1  }
  0x93   : > { %s369_s7 = sshll.u32 %s1872_s22, 4  ;;  %s1698_s26 = scalar_lea.hbm %s2372_s9, 1024  ;;  %s370_s7 = int_to_ptr.vmem [resolvable:$true] %s369_s7 }
  0x94   : > { %p1699_p11 = scmp.ne.s32.totalorder %s2372_s9, %s1698_s26  ;;  %p1705_p5 = scmp.lt.u32.totalorder %s1698_s26, %s2372_s9 }
  0x96   : > { %p1701_p6 = pnand %p1699_p11, %p2424_p3 }
  0x98   : > { %p1702_p8 = pneg %p1701_p6 }
  0x9a   : > { %p1707_p10 = pnand %p1705_p5, %p1702_p8 }
  0x9c   : > { %1710 = shalt.err (!%p1707_p10)
}
  0x9d   : > { %s1711_s15 = scalar_lea.vmem %s370_s7, 1024  ;;  %p1719_p0 = scmp.lt.s32.totalorder %s370_s7, %s370_s7 }
  0x9e   : > { %p1712_p2 = scmp.ne.s32.totalorder %s370_s7, %s1711_s15  ;;  %p1720_p7 = scmp.lt.s32.totalorder %s1711_s15, %s1711_s15 }
  0xa0   : > { %p1714_p4 = pnand %p1712_p2, %p2424_p3  ;;  %p1721_p9 = por %p1720_p7, %p1719_p0 }
  0xa2   : > { %p1715_p12 = pneg %p1714_p4 }
  0xa4   : > { %p1722_p13 = pnand %p1721_p9, %p1715_p12 }
  0xa6   : > { %1725 = shalt.err (!%p1722_p13)
}
  0xa7   : > { %1483 = dma.hbm_to_vmem [thread:$0]  (!%p2425_p1), %s2372_s9, 1024, %s370_s7, [#allocation12], %s2427_s3, %s2427_s3, %s2426_s1  }
  0xa8   : > { %s2171_s28 = scalar_lea.hbm %s2363_s0, %s2076_s11  ;;  %s390_s27 = scalar_lea.vmem [#allocation2], %s2073_s10 }
  0xa9   : > { %s397_s20 = sshll.u32 %s390_s27, 4  ;;  %s2428_s22 = sand.u32 1, %s1860_s19   ;;  %s398_s20 = int_to_ptr.vmem [resolvable:$true] %s397_s20 }
  0xaa   : > { %s387_s13 = scalar_lea.sflag [#allocation3], %s2428_s22  ;;  %s1726_s29 = scalar_lea.hbm %s2171_s28, 128 }
  0xab   : > { %p1727_p13 = scmp.ne.s32.totalorder %s2171_s28, %s1726_s29  ;;  %p2429_p3 = scmp.ne.s32.totalorder %s2423_s25, 0 }
  0xac   : > { %s1731_s7 = scalar_lea.hbm %s2363_s0, 256  ;;  %p1732_p1 = scmp.lt.u32.totalorder %s2171_s28, %s2363_s0 }
  0xad   : > { %p1729_p11 = pnand %p1727_p13, %p2429_p3  ;;  %p1733_p8 = scmp.lt.u32.totalorder %s1731_s7, %s1726_s29 }
  0xae   : > { %p1735_p10 = scmp.lt.u32.totalorder %s1726_s29, %s2171_s28 }
  0xaf   : > { %p1730_p6 = pneg %p1729_p11  ;;  %p1734_p5 = por %p1733_p8, %p1732_p1 }
  0xb1   : > { %p1736_p2 = por %p1735_p10, %p1734_p5 }
  0xb3   : > { %p1737_p4 = pnand %p1736_p2, %p1730_p6 }
  0xb5   : > { %1740 = shalt.err (!%p1737_p4)
}
  0xb6   : > { %s1741_s15 = scalar_lea.vmem %s398_s20, 128  ;;  %s1873_s4 = smov [#allocation2]  }
  0xb7   : > { %p1742_p12 = scmp.ne.s32.totalorder %s398_s20, %s1741_s15  ;;  %s1746_s8 = sshll.u32 %s1873_s4, 4  ;;  %s1747_s8 = int_to_ptr.vmem [resolvable:$false] %s1746_s8 }
  0xb8   : > { %s1748_s14 = scalar_lea.vmem %s1747_s8, 256  ;;  %p1749_p9 = scmp.lt.s32.totalorder %s398_s20, %s1747_s8 }
  0xb9   : > { %p1744_p0 = pnand %p1742_p12, %p2429_p3  ;;  %p1750_p13 = scmp.lt.s32.totalorder %s1748_s14, %s1741_s15 }
  0xbb   : > { %p1745_p7 = pneg %p1744_p0  ;;  %p1751_p11 = por %p1750_p13, %p1749_p9 }
  0xbd   : > { %p1752_p1 = pnand %p1751_p11, %p1745_p7 }
  0xbf   : > { %1755 = shalt.err (!%p1752_p1)
}
  0xc0   : > { %p2430_p8 = scmp.ne.s32.totalorder %s2421_s12, 0  ;;  %s2197_s22 = scalar_lea.hbm %s2365_s2, %s2076_s11 }
  0xc1   : > { %s426_s29 = scalar_lea.vmem [#allocation7], %s2073_s10  ;;  %s1756_s3 = scalar_lea.hbm %s2197_s22, 128 }
  0xc2   : > { %1487 = dma.hbm_to_vmem [thread:$0]  (!%p2430_p8), %s2171_s28, 128, %s398_s20, %s387_s13  }
  0xc3   : > { %s433_s1 = sshll.u32 %s426_s29, 4  ;;  %p1757_p6 = scmp.ne.s32.totalorder %s2197_s22, %s1756_s3  ;;  %s434_s1 = int_to_ptr.vmem [resolvable:$true] %s433_s1 }
  0xc4   : > { %s1761_s28 = scalar_lea.hbm %s2365_s2, 256  ;;  %p1762_p2 = scmp.lt.u32.totalorder %s2197_s22, %s2365_s2 }
  0xc5   : > { %p1759_p5 = pnand %p1757_p6, %p2429_p3  ;;  %p1763_p4 = scmp.lt.u32.totalorder %s1761_s28, %s1756_s3 }
  0xc6   : > { %p1765_p0 = scmp.lt.u32.totalorder %s1756_s3, %s2197_s22 }
  0xc7   : > { %p1760_p10 = pneg %p1759_p5  ;;  %p1764_p12 = por %p1763_p4, %p1762_p2 }
  0xc9   : > { %p1766_p7 = por %p1765_p0, %p1764_p12 }
  0xcb   : > { %p1767_p9 = pnand %p1766_p7, %p1760_p10 }
  0xcd   : > { %1770 = shalt.err (!%p1767_p9)
}
  0xce   : > { %s1771_s10 = scalar_lea.vmem %s434_s1, 128  ;;  %s1874_s11 = smov [#allocation7]  }
  0xcf   : > { %p1772_p13 = scmp.ne.s32.totalorder %s434_s1, %s1771_s10  ;;  %s1776_s17 = sshll.u32 %s1874_s11, 4  ;;  %s1777_s17 = int_to_ptr.vmem [resolvable:$false] %s1776_s17 }
  0xd0   : > { %s1778_s15 = scalar_lea.vmem %s1777_s17, 256  ;;  %p1779_p6 = scmp.lt.s32.totalorder %s434_s1, %s1777_s17 }
  0xd1   : > { %p1774_p11 = pnand %p1772_p13, %p2429_p3  ;;  %p1780_p5 = scmp.lt.s32.totalorder %s1778_s15, %s1771_s10 }
  0xd3   : > { %p1775_p1 = pneg %p1774_p11  ;;  %p1781_p8 = por %p1780_p5, %p1779_p6 }
  0xd5   : > { %p1782_p2 = pnand %p1781_p8, %p1775_p1 }
  0xd7   : > { %1785 = shalt.err (!%p1782_p2)
}
  0xd8   : > { %p2431_p4 = scmp.ne.s32.totalorder %s2421_s12, 0  ;;  %p2432_p10 = scmp.ne.s32.totalorder %s2409_s24, 0 }
  0xd9   : > { %s2221_s25 = sand.u32 (!%p2432_p10), 1, %s1856_s18   ;;  %p2433_p3 = scmp.ne.s32.totalorder (!%p2432_p10), %s2416_s16, 0 }
  0xda   : > { %1493 = dma.hbm_to_vmem [thread:$0]  (!%p2431_p4), %s2197_s22, 128, %s434_s1, %s2094_s30  }
  0xdb   : > { %442 = sbr.rel (%p2432_p10) target bundleno = 1463 (0x5b7), region = 64  ;;  %s2224_s4 = sshll.u32 (!%p2432_p10), %s2221_s25, 3 }
  0xdc   : > { %s445_s8 = scalar_lea.sflag (!%p2432_p10), [#allocation3], %s2221_s25  ;;  %s448_s14 = scalar_lea.vmem (!%p2432_p10), [#allocation2], %s2224_s4 }
  0xe2   : > { %1831 = dma.done.wait (%p2433_p3), %s445_s8, 128  }
  0xe3   : > { %1833 = vsyncadd (%p2433_p3), %s445_s8, 4294967168  ;;  %s453_s24 = sand.u32 1, %s1959_s23   ;;  %s457_s12 = scalar_lea.vmem [#allocation5], %s2224_s4 }
  0xe4   : > { %s454_s30 = scalar_lea.sflag [#allocation6], %s453_s24 }
  0xe5   : > { %1835 = dma.done.wait (%p2433_p3), %s454_s30, 256  }
  0xe6   : > { %1837 = vsyncadd (%p2433_p3), %s454_s30, 4294967040  ;;  %s466_s21 = scalar_lea.vmem [#allocation7], %s2224_s4  ;;  %p2434_p8 = scmp.eq.s32.totalorder %s1959_s23, 0 }
  0xe8   : > { %1839 = dma.done.wait (%p2434_p8), [#allocation9], 2048   ;;  %p2435_p12 = pmov %p2434_p8 }
  0xe9   : > { %p2436_p0 = pmov %p2434_p8 }
  0xea   : > { %1841 = vsyncadd (%p2435_p12), [#allocation9], 4294965248 }
  0xeb   : > { %1843 = dma.done.wait (%p2436_p0), [#allocation12], 2048   ;;  %p2437_p7 = pmov %p2436_p0 }
  0xec   : > { %v1875_v0 = vmov 0.0   ;;  %vm1876_vm0 = vmmov 0   ;;  %v1548_v1 = vld [vmem:[#allocation10] sm:$0xff]   ;;  %v1549_v2 = vld [vmem:[#allocation10 + $0x8] sm:$0xff]   ;;  %v1551_v5 = vld [vmem:[#allocation10 + $0x10] sm:$0xff]   ;;  %s2438_s1 = sld [smem:[#allocation28_spill]] }
  0xed   : > { %1845 = vsyncadd (%p2437_p7), [#allocation12], 4294965248  ;;  %1375 = vmatprep.subr.bf16.mxu1 %v1875_v0  ;;  %1355 = vmatprep.subr.bf16.mxu0 %v1875_v0  ;;  %v1550_v3 = vld [vmem:[#allocation8] sm:$0xff]   ;;  %v1552_v4 = vld [vmem:[#allocation8 + $0x8] sm:$0xff]   ;;  %s2439_s26 = sld [smem:[#allocation30_spill]]  ;;  %vm930_vm1 = vcmask 1043456  }
  0xee   : > { %1391 = vmatprep.mubr.msk.bf16.mxu1 %vm1876_vm0, %v1875_v0  ;;  %1371 = vmatprep.mubr.msk.bf16.mxu0 %vm1876_vm0, %v1875_v0  ;;  %v1554_v6 = vld [vmem:[#allocation8 + $0x10] sm:$0xff]   ;;  %v1553_v7 = vld [vmem:[#allocation10 + $0x18] sm:$0xff]   ;;  %v1555_v9 = vld [vmem:[#allocation10 + $0x20] sm:$0xff]   ;;  %vm913_vm2 = vcmask 64512   ;;  %s2440_s13 = sld [smem:[#allocation31_spill]]  ;;  %s2441_s10 = sld [smem:[#allocation24_spill]] }
  0xef   : > { %1376 = vmatpush3.bf16.msra.mxu1 %v1548_v1  ;;  %1356 = vmatpush3.bf16.msra.mxu0 %v1550_v3  ;;  %v1556_v8 = vld [vmem:[#allocation8 + $0x18] sm:$0xff]   ;;  %v1558_v10 = vld [vmem:[#allocation8 + $0x20] sm:$0xff]   ;;  %v1557_v11 = vld [vmem:[#allocation10 + $0x28] sm:$0xff]   ;;  %s1312_s11 = sshll.u32 %s1959_s23, 7  ;;  %s530_s17 = scalar_lea.vmem [#allocation14], %s2224_s4 }
  0xf0   : > { %1377 = vmatprep.subr.bf16.mxu1 %v1875_v0  ;;  %1357 = vmatprep.subr.bf16.mxu0 %v1875_v0  ;;  %v1560_v12 = vld [vmem:[#allocation8 + $0x28] sm:$0xff]   ;;  %v1559_v13 = vld [vmem:[#allocation10 + $0x30] sm:$0xff]   ;;  %v1561_v14 = vld [vmem:[#allocation10 + $0x38] sm:$0xff]   ;;  %s1101_s15 = sshll.u32 %s530_s17, 4  ;;  %s2442_s24 = sld [smem:[#allocation32_spill]]  ;;  %s2321_s15 = int_to_ptr.vmem [resolvable:$true] %s1101_s15 }
  0xf1   : > { %v1562_v15 = vld [vmem:[#allocation8 + $0x30] sm:$0xff]   ;;  %v645_v16 = vld [vmem:[%s457_s12] sm:$0xff]  ;;  %v1563_v17 = vld [vmem:[#allocation8 + $0x38] sm:$0xff]   ;;  %s1088_s12 = scalar_lea.sflag [#allocation4], %s2221_s25  ;;  %s1786_s23 = scalar_lea.vmem %s2321_s15, 128 }
  0xf2   : > { %v532_v18 = vld [vmem:[%s448_s14] sm:$0xff]  ;;  %v646_v19 = vpack.c.bf16 %v645_v16, %v645_v16  ;;  %v1564_v21 = vld [vmem:[#allocation11] sm:$0xff]   ;;  %v1565_v22 = vld [vmem:[#allocation11 + $0x8] sm:$0xff]   ;;  %p1787_p9 = scmp.ne.s32.totalorder %s2321_s15, %s1786_s23  ;;  %s1877_s4 = smov [#allocation14]  }
  0xf3   : > { %1378 = vmatpush3.bf16.msra.mxu1 %v1549_v2  ;;  %1358 = vmatpush3.bf16.msra.mxu0 %v1552_v4  ;;  %v533_v20 = vpack.c.bf16 %v532_v18, %v532_v18  ;;  %v1566_v23 = vld [vmem:[#allocation11 + $0x10] sm:$0xff]   ;;  %v1567_v24 = vld [vmem:[#allocation11 + $0x18] sm:$0xff]   ;;  %v1568_v25 = vld [vmem:[#allocation11 + $0x20] sm:$0xff]  }
  0xf4   : > { %1379 = vmatprep.subr.bf16.mxu1 %v1875_v0  ;;  %1359 = vmatprep.subr.bf16.mxu0 %v1875_v0  ;;  %v1569_v26 = vld [vmem:[#allocation11 + $0x28] sm:$0xff]   ;;  %v1570_v27 = vld [vmem:[#allocation11 + $0x30] sm:$0xff]   ;;  %v1571_v28 = vld [vmem:[#allocation11 + $0x38] sm:$0xff]   ;;  %p2443_p13 = scmp.ne.s32.totalorder %s2441_s10, 0 }
  0xf5   : > { %v758_v29 = vld [vmem:[%s466_s21] sm:$0xff]  ;;  %v1572_v3 = vld [vmem:[#allocation13] sm:$0xff]   ;;  %s1790_s21 = sshll.u32 %s1877_s4, 4  ;;  %s1791_s21 = int_to_ptr.vmem [resolvable:$false] %s1790_s21 }
  0xf6   : > { %v759_v30 = vpack.c.bf16 %v758_v29, %v758_v29  ;;  %v1283_v31 = vld [vmem:[%s2369_s6] ss:$0 sm:$0xff]  ;;  %s2319_s30 = scalar_lea.hbm %s2442_s24, %s1312_s11  ;;  %p1788_p11 = pnand %p1787_p9, %p2443_p13 }
  0xf7   : > { %1380 = vmatpush3.bf16.msra.mxu1 %v1551_v5  ;;  %1360 = vmatpush3.bf16.msra.mxu0 %v1554_v6  ;;  %v1274_v35 = vld [vmem:[%s2438_s1] ss:$0 sm:$0xff]  ;;  %v1573_v5 = vld [vmem:[#allocation13 + $0x8] sm:$0xff]   ;;  %s1792_s16 = scalar_lea.vmem %s1791_s21, 256  ;;  %p1793_p6 = scmp.lt.s32.totalorder %s2321_s15, %s1791_s21 }
  0xf8   : > { %1381 = vmatprep.subr.bf16.mxu1 %v1875_v0  ;;  %1361 = vmatprep.subr.bf16.mxu0 %v1875_v0  ;;  %v1292_v45 = vld [vmem:[%s2439_s26] ss:$0 sm:$0xff]  ;;  %p1789_p1 = pneg %p1788_p11  ;;  %p1794_p5 = scmp.lt.s32.totalorder %s1792_s16, %s1786_s23 }
  0xf9   : > { %v1574_v6 = vld [vmem:[#allocation13 + $0x10] sm:$0xff]  }
  0xfa   : > { %p1795_p2 = por %p1794_p5, %p1793_p6 }
  0xfb   : > { %1382 = vmatpush3.bf16.msra.mxu1 %v1553_v7  ;;  %1362 = vmatpush3.bf16.msra.mxu0 %v1556_v8  ;;  %v1575_v7 = vld [vmem:[#allocation13 + $0x18] sm:$0xff]   ;;  %v1576_v8 = vld [vmem:[#allocation13 + $0x20] sm:$0xff]  }
  0xfc   : > { %1383 = vmatprep.subr.bf16.mxu1 %v1875_v0  ;;  %1363 = vmatprep.subr.bf16.mxu0 %v1875_v0  ;;  %p1796_p4 = pnand %p1795_p2, %p1789_p1 }
  0xff   : > { %1384 = vmatpush3.bf16.msra.mxu1 %v1555_v9  ;;  %1364 = vmatpush3.bf16.msra.mxu0 %v1558_v10  ;;  %v1577_v9 = vld [vmem:[#allocation13 + $0x28] sm:$0xff]   ;;  %v1578_v10 = vld [vmem:[#allocation13 + $0x30] sm:$0xff]  }
 0x100   : > { %1385 = vmatprep.subr.bf16.mxu1 %v1875_v0  ;;  %1365 = vmatprep.subr.bf16.mxu0 %v1875_v0 }
 0x103   : > { %1386 = vmatpush3.bf16.msra.mxu1 %v1557_v11  ;;  %1366 = vmatpush3.bf16.msra.mxu0 %v1560_v12  ;;  %v1579_v11 = vld [vmem:[#allocation13 + $0x38] sm:$0xff]  }
 0x104   : > { %1387 = vmatprep.subr.bf16.mxu1 %v1875_v0  ;;  %1367 = vmatprep.subr.bf16.mxu0 %v1875_v0 }
 0x107   : > { %1388 = vmatpush3.bf16.msra.mxu1 %v1559_v13  ;;  %1368 = vmatpush3.bf16.msra.mxu0 %v1562_v15 }
 0x108   : > { %1389 = vmatprep.subr.bf16.mxu1 %v1875_v0  ;;  %1369 = vmatprep.subr.bf16.mxu0 %v1875_v0 }
 0x10b   : > { %1390 = vmatpush3.bf16.msra.mxu1 %v1561_v14  ;;  %1370 = vmatpush3.bf16.msra.mxu0 %v1563_v17  ;;  %v1302_v17 = vld [vmem:[%s2440_s13] ss:$0 sm:$0xff] }
 0x10c   : > { %1421 = vmatprep.subr.bf16.mxu1 %v1875_v0  ;;  %1395 = vmatprep.subr.bf16.mxu0 %v1875_v0 }
 0x10e   : > { %1392 = vmatmul.mubr.bf16.vlgmr.msra.gmra.mrb[0].mxu1 %v646_v19  ;;  %1372 = vmatmul.mubr.bf16.vlgmr.msra.gmra.mrb[0].mxu0 %v533_v20 }
 0x10f   : > { %1423 = vmatprep.mubr.msk.bf16.mxu1 %vm1876_vm0, %v1875_v0  ;;  %1396 = vmatpush3.bf16.msra.mxu0 %v1564_v21 }
 0x110   : > { %1411 = vmatprep.mubr.msk.bf16.mxu0 %vm1876_vm0, %v1875_v0  ;;  %1397 = vmatprep.subr.bf16.mxu0 %v1875_v0 }
 0x113   : > { %1398 = vmatpush3.bf16.msra.mxu0 %v1565_v22 }
 0x114   : > { %1399 = vmatprep.subr.bf16.mxu0 %v1875_v0 }
 0x117   : > { %1400 = vmatpush3.bf16.msra.mxu0 %v1566_v23 }
 0x118   : > { %1401 = vmatprep.subr.bf16.mxu0 %v1875_v0 }
 0x11b   : > { %1402 = vmatpush3.bf16.msra.mxu0 %v1567_v24 }
 0x11c   : > { %1403 = vmatprep.subr.bf16.mxu0 %v1875_v0 }
 0x11f   : > { %1404 = vmatpush3.bf16.msra.mxu0 %v1568_v25 }
 0x120   : > { %1405 = vmatprep.subr.bf16.mxu0 %v1875_v0 }
 0x123   : > { %1406 = vmatpush3.bf16.msra.mxu0 %v1569_v26 }
 0x124   : > { %1407 = vmatprep.subr.bf16.mxu0 %v1875_v0 }
 0x127   : > { %1408 = vmatpush3.bf16.msra.mxu0 %v1570_v27 }
 0x128   : > { %1409 = vmatprep.subr.bf16.mxu0 %v1875_v0 }
 0x12b   : > { %1410 = vmatpush3.bf16.msra.mxu0 %v1571_v28 }
 0x12c   : > { %1415 = vmatprep.subr.bf16.mxu0 %v1875_v0 }
 0x12e   : > { %1412 = vmatmul.mubr.bf16.vlgmr.msra.gmra.mrb[4].mxu0 %v759_v30 }
 0x12f   : > { %1417 = vmatprep.mubr.msk.bf16.mxu0 %vm1876_vm0, %v1875_v0 }
 0x1e1   : > { %v752_v32 = vpop.f32.mrb[0].mxu1  ;;  %v639_v37 = vpop.f32.mrb[0].mxu0 }
 0x1e2   : > { %v753_v33 = vadd.f32 %v1283_v31, %v752_v32  ;;  %v1393_v34 = vpop.f32.mrb[1].mxu1  ;;  %v1373_v40 = vpop.f32.mrb[1].mxu0  ;;  %v640_v41 = vadd.f32 %v1274_v35, %v639_v37 }
 0x1e3   : > { %v755_v36 = vpop.f32.mrb[2].mxu1  ;;  %v642_v42 = vpop.f32.mrb[2].mxu0 }
 0x1e4   : > { %v872_v38 = vpack.c.bf16 %v753_v33, %v753_v33  ;;  %v1394_v39 = vpop.f32.mrb[3].mxu1  ;;  %v1374_v43 = vpop.f32.mrb[3].mxu0  ;;  %v871_v44 = vpack.c.bf16 %v640_v41, %v640_v41 }
 0x1e6   : > { %1416 = vmatpush3.bf16.xpose.msra.mxu0 %v872_v38 }
 0x1ed   : > { %1418 = vmatmul.mubr.bf16.vlgmr.msra.gmra.mrb[8].mxu0 %v871_v44 }
 0x201   : > { %v865_v46 = vpop.f32.mrb[4].mxu0 }
 0x202   : > { %v866_v47 = vadd.f32 %v1292_v45, %v865_v46  ;;  %v1413_v48 = vpop.f32.mrb[5].mxu0 }
 0x203   : > { %v868_v49 = vpop.f32.mrb[6].mxu0 }
 0x204   : > { %v926_v50 = vpack.c.bf16 %v866_v47, %v866_v47  ;;  %v1414_v51 = vpop.f32.mrb[7].mxu0 }
 0x206   : > { %v932_v52 = vsel %vm930_vm1, %v926_v50, 0 }
 0x207   : > { %1422 = vmatpush3.bf16.msra.mxu1 %v932_v52 }
 0x208   : > { %1427 = vmatprep.subr.bf16.mxu1 %v1875_v0 }
 0x2c0   : > { %v907_v53 = vpop.f32.mrb[8].mxu0 }
 0x2c1   : > { %v1419_v54 = vpop.f32.mrb[9].mxu0  ;;  %v914_v55 = vsel %vm913_vm2, %v907_v53, -inf }
 0x2c2   : > { %915 = vmax.xlane.f32.xlu0 %v914_v55  ;;  %v910_v56 = vpop.f32.mrb[10].mxu0 }
 0x2c3   : > { %v1420_v57 = vpop.f32.mrb[11].mxu0 }
 0x34f   : > { %v916_v58 = vpop.xlane.xlu0 %915 }
 0x350   : > { %v917_v59 = vsub.f32 %v907_v53, %v916_v58 }
 0x352   : > { %v918_v60 = vmul.f32 1.442695, %v917_v59 }
 0x354   : > { %1580 = vpow2.f32 %v918_v60 }
 0x35e   : > { %v1581_v61 = vpop.eup %1580 }
 0x35f   : > { %v920_v62 = vsel %vm913_vm2, %v1581_v61, 0.0 }
 0x360   : > { %921 = vadd.xlane.f32.xlu0 %v920_v62 }
 0x3ed   : > { %v922_v63 = vpop.xlane.xlu0 %921 }
 0x3ee   : > { %1582 = vrcp.f32 %v922_v63 }
 0x3f8   : > { %v1583_v1 = vpop.eup %1582 }
 0x3f9   : > { %v924_v2 = vmul.f32 %v1583_v1, %v1581_v61 }
 0x3fb   : > { %v925_v4 = vpack.c.bf16 %v924_v2, %v924_v2 }
 0x3fd   : > { %1424 = vmatmul.mubr.msk.bf16.vlgmr.msra.gmra.mrb[4].mxu1 %vm913_vm2, %v925_v4 }
 0x3fe   : > { %1428 = vmatpush3.bf16.msra.mxu1 %v1572_v3  ;;  %1443 = vmatprep.mubr.msk.bf16.mxu1 %vm1876_vm0, %v1875_v0 }
 0x3ff   : > { %1429 = vmatprep.subr.bf16.mxu1 %v1875_v0 }
 0x402   : > { %1430 = vmatpush3.bf16.msra.mxu1 %v1573_v5 }
 0x403   : > { %1431 = vmatprep.subr.bf16.mxu1 %v1875_v0 }
 0x406   : > { %1432 = vmatpush3.bf16.msra.mxu1 %v1574_v6 }
 0x407   : > { %1433 = vmatprep.subr.bf16.mxu1 %v1875_v0 }
 0x40a   : > { %1434 = vmatpush3.bf16.msra.mxu1 %v1575_v7 }
 0x40b   : > { %1435 = vmatprep.subr.bf16.mxu1 %v1875_v0 }
 0x40e   : > { %1436 = vmatpush3.bf16.msra.mxu1 %v1576_v8 }
 0x40f   : > { %1437 = vmatprep.subr.bf16.mxu1 %v1875_v0 }
 0x412   : > { %1438 = vmatpush3.bf16.msra.mxu1 %v1577_v9 }
 0x413   : > { %1439 = vmatprep.subr.bf16.mxu1 %v1875_v0 }
 0x416   : > { %1440 = vmatpush3.bf16.msra.mxu1 %v1578_v10 }
 0x417   : > { %1441 = vmatprep.subr.bf16.mxu1 %v1875_v0 }
 0x41a   : > { %1442 = vmatpush3.bf16.msra.mxu1 %v1579_v11 }
 0x4d0   : > { %v968_v12 = vpop.f32.mrb[4].mxu1 }
 0x4d1   : > { %v974_v13 = vpack.c.bf16 %v968_v12, %v968_v12  ;;  %v1425_v14 = vpop.f32.mrb[5].mxu1 }
 0x4d2   : > { %v971_v15 = vpop.f32.mrb[6].mxu1 }
 0x4d3   : > { %v1426_v16 = vpop.f32.mrb[7].mxu1  ;;  %1444 = vmatmul.mubr.bf16.vlgmr.msra.gmra.mrb[8].mxu1 %v974_v13 }
 0x5a6   : > { %v1080_v18 = vpop.f32.mrb[8].mxu1 }
 0x5a7   : > { %v1081_v19 = vadd.f32 %v1302_v17, %v1080_v18  ;;  %v1445_v0 = vpop.f32.mrb[9].mxu1 }
 0x5a8   : > { %v1083_v20 = vpop.f32.mrb[10].mxu1 }
 0x5a9   : > { %1086 = vst [vmem:[%s530_s17] sm:$0xff] %v1081_v19  ;;  %v1446_v21 = vpop.f32.mrb[11].mxu1 }
 0x5aa   : > { %1799 = shalt.err (!%p1796_p4)
}
 0x5ab   : > { %s1800_s25 = scalar_lea.hbm %s2319_s30, 128  ;;  %s1804_s29 = scalar_lea.hbm %s2442_s24, 256 }
 0x5ac   : > { %p1801_p10 = scmp.ne.s32.totalorder %s2319_s30, %s1800_s25  ;;  %p1805_p12 = scmp.lt.u32.totalorder %s2319_s30, %s2442_s24 }
 0x5ad   : > { %p1806_p0 = scmp.lt.u32.totalorder %s1804_s29, %s1800_s25  ;;  %p1808_p9 = scmp.lt.u32.totalorder %s1800_s25, %s2319_s30 }
 0x5ae   : > { %p1802_p3 = pnand %p1801_p10, %p2443_p13 }
 0x5af   : > { %p1807_p7 = por %p1806_p0, %p1805_p12 }
 0x5b0   : > { %p1803_p8 = pneg %p1802_p3 }
 0x5b1   : > { %p1809_p11 = por %p1808_p9, %p1807_p7 }
 0x5b3   : > { %p1810_p1 = pnand %p1809_p11, %p1803_p8 }
 0x5b5   : > { %1813 = shalt.err (!%p1810_p1)
}
 0x5b6   : > { %1469 = dma.vmem_to_hbm [thread:$0]  (%p2443_p13), %s2321_s15, 128, %s2319_s30, %s1088_s12  }
 0x5b7 PF: > { %s2444_s7 = sld [smem:[#allocation20_spill]]  ;;  %s2445_s26 = sld [smem:[#allocation25_spill]] }
 0x5b8   : > { %s2446_s28 = sld [smem:[#allocation21_spill]] }
 0x5bd   : > { %s1113_s20 = sand.u32 1, %s2444_s7   ;;  %p2447_p6 = scmp.ne.s32.totalorder %s2445_s26, 0 }
 0x5be   : > { %p2448_p5 = scmp.ge.s32.totalorder %s2446_s28, 2  ;;  %s1114_s13 = scalar_lea.sflag [#allocation4], %s1113_s20 }
 0x5c0   : > { %p1495_p2 = pnand %p2448_p5, %p2447_p6 }
 0x5c2   : > { %1847 = dma.done.wait (!%p1495_p2), %s1114_s13, 128  }
 0x5c3   : > { %1849 = vsyncadd (!%p1495_p2), %s1114_s13, 4294967168  ;;  %s2449_s20 = sld [smem:[#allocation22_spill]]  ;;  %s2450_s11 = sld [smem:[#allocation23_spill]] }
 0x5c4   : > { %s2451_s17 = smov %s1856_s18  ;;  %s2452_s18 = smov %s1860_s19 }
 0x5c9   : > { %p29_p4 = scmp.ge.s32.totalorder %s2449_s20, 4   ;;  %s2453_s19 = smov %s2450_s11 }
 0x5cb   :  { %31 = sbr.rel (!%p29_p4) target bundleno = 17 (0x11), region = 149 }
 0x5d2   :  { %1119 = vsyncpa [#allocation3], 1 }
 0x5d3   :  { %1121 = vsyncpa [#allocation3 + $0x1], 1 }
 0x5d4   :  { %1122 = vsyncpa [#allocation6], 1 }
 0x5d5   :  { %1124 = vsyncpa [#allocation6 + $0x1], 1 }
 0x5d6   :  { %1125 = vsyncpa [#allocation9], 1 }
 0x5d7   :  { %1126 = vsyncpa [#allocation12], 1 }
 0x5d8   :  { %1127 = vsyncpa [#allocation4], 1 }
 0x5d9   :  { %1129 = vsyncpa [#allocation4 + $0x1], 1 }

</bundles_post_ra>
